<compile_context>
chip_gen: v7x
topology: tpu7x:2x2x1
jax: 0.10.0
libtpu: 0.0.40
codegen_flags: <defaults>
</compile_context>

<pallas_src>
import functools
import math

import numpy as np
import jax
import jax.numpy as jnp
from jax.experimental import pallas as pl
from jax.experimental.pallas import tpu as pltpu

IN_CHANNELS = 3
HIDDEN = 8
EPS = 1e-10
LOW_T = 0.1      # lowThreshold  init: ones(C,1,1)*0.1
HIGH_T = 0.2     # highThreshold init: ones(C,1,1)*0.2
ALPHA = 1000.0
SIGMA = 3.0


def _gauss_1d(k=3, sigma=1.0):
    # mu=0 makes the reference 2D gaussian exactly separable:
    #   normalized_2D = outer(a, a)/sum(a)^2 with a_i = exp(-x_i^2/(2 sigma^2)).
    g = np.linspace(-1.0, 1.0, k)
    a = np.exp(-(g ** 2) / (2.0 * sigma ** 2))
    return a / np.sum(a)


GAUSS_1D = _gauss_1d(3, SIGMA)           # symmetric, sums to 1

# canny_nms kernel k is `center - neighbor(offset_k)`; offsets in channel order.
# Opposite pairs: offset[k+4] == -offset[k].  These 8 offsets are also exactly
# the 8 non-center 3x3 taps, so the same mask table serves gauss/sobel/NMS.
NMS_OFFSETS = [(0, 1), (1, 1), (1, 0), (1, -1), (0, -1), (-1, -1), (-1, 0), (-1, 1)]


def _make_masks_np(H, W):
    """(8, H*W) f32 validity masks for every 3x3 neighbor offset.

    A rolled neighbor on the flattened (h*W + w) axis wraps at row seams and at
    the array ends; multiplying by these masks restores zero-padding semantics.
    Built with numpy at trace time -> compile-time constant, zero in-kernel cost.
    """
    HW = H * W
    rows = np.arange(HW, dtype=np.int64) // W
    cols = np.arange(HW, dtype=np.int64) % W
    out = np.empty((len(NMS_OFFSETS), HW), dtype=np.float32)
    for k, (dy, dx) in enumerate(NMS_OFFSETS):
        valid = ((rows + dy >= 0) & (rows + dy < H) &
                 (cols + dx >= 0) & (cols + dx < W))
        out[k] = valid.astype(np.float32)
    return out


# ------------------------------ fused kernel ---------------------------------

def canny_kernel(w_ref, m_ref, x_ref, out_ref, *, H, W):
    HW = H * W
    m = m_ref[...]                                            # (8, HW)
    # (1, HW) mask rows broadcast correctly against both (B,HW) and (B,C,HW).
    masks = {off: m[k:k + 1, :] for k, off in enumerate(NMS_OFFSETS)}

    def shift(a, dy, dx):
        """Zero-padded neighbor a[..., h+dy, w+dx] on the flat (h*W+w) axis."""
        s = dy * W + dx
        rolled = pltpu.roll(a, shift=(-s) % HW, axis=a.ndim - 1)
        return rolled * masks[(dy, dx)]

    x = x_ref[...]                                            # (B, Cin, HW)
    w = w_ref[...]                                            # (Cin, HIDDEN, 1)
    B, Cin = x.shape[0], x.shape[1]

    # conv_expand: 1x1 Cin -> HIDDEN as broadcast-FMA (no sublane concat).
    h = w[0:1] * x[:, 0:1, :]                                 # (B, HIDDEN, HW)
    for i in range(1, Cin):
        h = h + w[i:i + 1] * x[:, i:i + 1, :]

    # conv_gauss: depthwise 3x3 zero-padded, separable row + column passes.
    c0, c1 = float(GAUSS_1D[0]), float(GAUSS_1D[1])
    gr = c1 * h + c0 * (shift(h, 0, -1) + shift(h, 0, 1))
    g = c1 * gr + c0 * (shift(gr, -1, 0) + shift(gr, 1, 0))
    # conv_permute_gauss / _sobel_x / _sobel_y: identity 1x1 convs -> no-ops.

    # Sobel (separable): x-kernel = [0.5,1,0.5]^T outer [-1,0,1]; y = transpose.
    dxg = shift(g, 0, 1) - shift(g, 0, -1)
    sx = dxg + 0.5 * (shift(dxg, -1, 0) + shift(dxg, 1, 0))
    dyg = shift(g, 1, 0) - shift(g, -1, 0)
    sy = dyg + 0.5 * (shift(dyg, 0, -1) + shift(dyg, 0, 1))

    # ---- non_maximal_suppression ----
    magnitude = jnp.sqrt((sx + EPS) ** 2 + (sy + EPS) ** 2)   # (B, HIDDEN, HW)

    # torch.gather only ever reads NMS channels 0..7 = the directional
    # responses of magnitude channel 0; min(nms[k], nms[k+4]) =
    # mag0 - max(neighbor_k, neighbor_{k+4}).  Packed to (B, HW).
    mag0 = magnitude[:, 0, :]                                 # (B, HW)
    pair_min = []
    for k in range(4):
        nb = jnp.maximum(shift(mag0, *NMS_OFFSETS[k]),
                         shift(mag0, *NMS_OFFSETS[k + 4]))
        pair_min.append(mag0 - nb)

    # atan2-free angle approximation (same formula as the reference),
    # per hidden channel.  Exact division to keep 45-degree bin parity.
    diff = (sy + EPS) / (sx + EPS)
    m_diff = 1.2276 * diff
    sig = jax.nn.sigmoid(m_diff)
    angle = (math.pi / 2.0) * jnp.tanh(0.2714 * diff) \
        + 1.8022 * m_diff * sig * (1.0 - sig)
    q = jnp.round(angle * (180.0 / math.pi) / 45.0)           # integer-valued float
    qm = q - 4.0 * jnp.floor(q * 0.25)                        # q mod 4 in {0..3}
    idx4 = qm.astype(jnp.int32)                               # (B, HIDDEN, HW)

    sel = jnp.where(idx4 == 0, pair_min[0][:, None, :], 0.0)
    for k in range(1, 4):
        sel = sel + jnp.where(idx4 == k, pair_min[k][:, None, :], 0.0)
    thin = jnp.where(sel > 0.0, magnitude, 0.0)               # (B, HIDDEN, HW)

    # ---- normalize by the GLOBAL max (couples the batch, fused in-kernel) ----
    gmax = jnp.max(thin)
    norm = thin / gmax                                        # gmax==0 -> nan, like torch

    # threshold(): sigmoid(-z) = 1 - sigmoid(z) folds 3 sigmoids into 2:
    #   res = 0.5*sigmoid(a*(x-HIGH)) + 0.5*sigmoid(a*(x-LOW))
    res = 0.5 * (jax.nn.sigmoid(ALPHA * (norm - HIGH_T))
                 + jax.nn.sigmoid(ALPHA * (norm - LOW_T)))

    # conv_merge: softmax over dim 0 of a (1,C,1,1) weight == all ones ->
    # channel sum, then clamp to [0, 1].  Output packed as (B, HW).
    out_ref[...] = jnp.clip(jnp.sum(res, axis=1), 0.0, 1.0)


# ------------------------------ wrapper --------------------------------------

@jax.jit
def canny_forward(x, w_expand):
    B, Cin, H, W = x.shape
    assert Cin == IN_CHANNELS
    hidden = w_expand.shape[0]
    HW = H * W

    # Lane-dense layout: flatten the spatial dims into the trailing (lane) axis.
    x_flat = x.reshape(B, Cin, HW)
    # Expand weight as (Cin, HIDDEN, 1) columns for the in-kernel broadcast-FMA.
    w_col = jnp.transpose(w_expand, (1, 0)).reshape(Cin, hidden, 1)
    # Compile-time constant zero-padding masks (no in-kernel iota/compares).
    masks = jnp.asarray(_make_masks_np(H, W))

    out_flat = pl.pallas_call(
        functools.partial(canny_kernel, H=H, W=W),
        out_shape=jax.ShapeDtypeStruct((B, HW), jnp.float32),
        grid=(1,),                                            # single fused step
        in_specs=[
            pl.BlockSpec((Cin, hidden, 1), lambda i: (0, 0, 0)),   # expand weights
            pl.BlockSpec((len(NMS_OFFSETS), HW), lambda i: (0, 0)),  # edge masks
            pl.BlockSpec((B, Cin, HW), lambda i: (0, 0, 0)),       # image
        ],
        out_specs=pl.BlockSpec((B, HW), lambda i: (0, 0)),         # lane-dense out
        compiler_params=pltpu.CompilerParams(
            dimension_semantics=("arbitrary",)),
    )(w_col, masks, x_flat)

    return out_flat.reshape(B, 1, H, W)


if __name__ == "__main__":
    key = jax.random.PRNGKey(0)
    kx, kw = jax.random.split(key)

    B, H, W = 2, 16, 16
    x = jax.random.normal(kx, (B, IN_CHANNELS, H, W), dtype=jnp.float32)

    # conv_expand init: softmax(rand_like(weight), dim=0), weight (HIDDEN, Cin, 1, 1)
    w_raw = jax.random.uniform(kw, (HIDDEN, IN_CHANNELS, 1, 1), dtype=jnp.float32)
    w_expand = jax.nn.softmax(w_raw, axis=0).reshape(HIDDEN, IN_CHANNELS)

    out = canny_forward(x, w_expand)
    jax.block_until_ready(out)
    assert out.shape == (B, 1, H, W) and out.dtype == jnp.float32
    print("KERNEL_OK")
</pallas_src>

<mosaic_0001>
module attributes {stable_mosaic.version = 11 : i64} {
  func.func @canny_kernel(%arg0: i32, %arg1: memref<3x8x1xf32, #tpu.memory_space<vmem>>, %arg2: memref<8x256xf32, #tpu.memory_space<vmem>>, %arg3: memref<2x3x256xf32, #tpu.memory_space<vmem>>, %arg4: memref<2x256xf32, #tpu.memory_space<vmem>>) attributes {dimension_semantics = [#tpu.dimension_semantics<arbitrary>], iteration_bounds = array<i64: 1>, scalar_prefetch = 0 : i64, scratch_operands = 0 : i64, tpu.core_type = #tpu.core_type<tc>, window_params = [{pipeline_mode = #tpu.pipeline_mode<synchronous>, transform_indices = @transform_0, window_bounds = array<i64: 3, 8, 1>}, {pipeline_mode = #tpu.pipeline_mode<synchronous>, transform_indices = @transform_1, window_bounds = array<i64: 8, 256>}, {pipeline_mode = #tpu.pipeline_mode<synchronous>, transform_indices = @transform_2, window_bounds = array<i64: 2, 3, 256>}, {pipeline_mode = #tpu.pipeline_mode<synchronous>, transform_indices = @transform_3, window_bounds = array<i64: 2, 256>}]} {
    %c0 = arith.constant 0 : index
    %c0_0 = arith.constant 0 : index
    %0 = vector.load %arg2[%c0, %c0_0] : memref<8x256xf32, #tpu.memory_space<vmem>>, vector<8x256xf32>
    %1 = vector.extract_strided_slice %0 {offsets = [0, 0], sizes = [1, 256], strides = [1, 1]} : vector<8x256xf32> to vector<1x256xf32>
    %2 = vector.extract_strided_slice %0 {offsets = [1, 0], sizes = [1, 256], strides = [1, 1]} : vector<8x256xf32> to vector<1x256xf32>
    %3 = vector.extract_strided_slice %0 {offsets = [2, 0], sizes = [1, 256], strides = [1, 1]} : vector<8x256xf32> to vector<1x256xf32>
    %4 = vector.extract_strided_slice %0 {offsets = [3, 0], sizes = [1, 256], strides = [1, 1]} : vector<8x256xf32> to vector<1x256xf32>
    %5 = vector.extract_strided_slice %0 {offsets = [4, 0], sizes = [1, 256], strides = [1, 1]} : vector<8x256xf32> to vector<1x256xf32>
    %6 = vector.extract_strided_slice %0 {offsets = [5, 0], sizes = [1, 256], strides = [1, 1]} : vector<8x256xf32> to vector<1x256xf32>
    %7 = vector.extract_strided_slice %0 {offsets = [6, 0], sizes = [1, 256], strides = [1, 1]} : vector<8x256xf32> to vector<1x256xf32>
    %8 = vector.extract_strided_slice %0 {offsets = [7, 0], sizes = [1, 256], strides = [1, 1]} : vector<8x256xf32> to vector<1x256xf32>
    %c0_1 = arith.constant 0 : index
    %c0_2 = arith.constant 0 : index
    %c0_3 = arith.constant 0 : index
    %9 = vector.load %arg3[%c0_1, %c0_2, %c0_3] : memref<2x3x256xf32, #tpu.memory_space<vmem>>, vector<2x3x256xf32>
    %c0_4 = arith.constant 0 : index
    %c0_5 = arith.constant 0 : index
    %c0_6 = arith.constant 0 : index
    %10 = vector.load %arg1[%c0_4, %c0_5, %c0_6] : memref<3x8x1xf32, #tpu.memory_space<vmem>>, vector<3x8x1xf32>
    %11 = vector.extract_strided_slice %10 {offsets = [0, 0, 0], sizes = [1, 8, 1], strides = [1, 1, 1]} : vector<3x8x1xf32> to vector<1x8x1xf32>
    %12 = vector.extract_strided_slice %9 {offsets = [0, 0, 0], sizes = [2, 1, 256], strides = [1, 1, 1]} : vector<2x3x256xf32> to vector<2x1x256xf32>
    %13 = vector.broadcast %11 : vector<1x8x1xf32> to vector<2x8x256xf32>
    %14 = vector.broadcast %12 : vector<2x1x256xf32> to vector<2x8x256xf32>
    %15 = arith.mulf %13, %14 : vector<2x8x256xf32>
    %16 = vector.extract_strided_slice %10 {offsets = [1, 0, 0], sizes = [1, 8, 1], strides = [1, 1, 1]} : vector<3x8x1xf32> to vector<1x8x1xf32>
    %17 = vector.extract_strided_slice %9 {offsets = [0, 1, 0], sizes = [2, 1, 256], strides = [1, 1, 1]} : vector<2x3x256xf32> to vector<2x1x256xf32>
    %18 = vector.broadcast %16 : vector<1x8x1xf32> to vector<2x8x256xf32>
    %19 = vector.broadcast %17 : vector<2x1x256xf32> to vector<2x8x256xf32>
    %20 = arith.mulf %18, %19 : vector<2x8x256xf32>
    %21 = arith.addf %15, %20 : vector<2x8x256xf32>
    %22 = vector.extract_strided_slice %10 {offsets = [2, 0, 0], sizes = [1, 8, 1], strides = [1, 1, 1]} : vector<3x8x1xf32> to vector<1x8x1xf32>
    %23 = vector.extract_strided_slice %9 {offsets = [0, 2, 0], sizes = [2, 1, 256], strides = [1, 1, 1]} : vector<2x3x256xf32> to vector<2x1x256xf32>
    %24 = vector.broadcast %22 : vector<1x8x1xf32> to vector<2x8x256xf32>
    %25 = vector.broadcast %23 : vector<2x1x256xf32> to vector<2x8x256xf32>
    %26 = arith.mulf %24, %25 : vector<2x8x256xf32>
    %27 = arith.addf %21, %26 : vector<2x8x256xf32>
    %cst = arith.constant 0.345791161 : f32
    %28 = vector.broadcast %cst : f32 to vector<2x8x256xf32>
    %29 = arith.mulf %28, %27 : vector<2x8x256xf32>
    %c1_i32 = arith.constant 1 : i32
    %30 = tpu.dynamic_rotate %27 by %c1_i32 dim 2 : vector<2x8x256xf32>, i32 -> vector<2x8x256xf32>
    %31 = vector.shape_cast %5 : vector<1x256xf32> to vector<1x1x256xf32>
    %32 = vector.broadcast %31 : vector<1x1x256xf32> to vector<2x8x256xf32>
    %33 = arith.mulf %30, %32 : vector<2x8x256xf32>
    %c255_i32 = arith.constant 255 : i32
    %34 = tpu.dynamic_rotate %27 by %c255_i32 dim 2 : vector<2x8x256xf32>, i32 -> vector<2x8x256xf32>
    %35 = vector.shape_cast %1 : vector<1x256xf32> to vector<1x1x256xf32>
    %36 = vector.broadcast %35 : vector<1x1x256xf32> to vector<2x8x256xf32>
    %37 = arith.mulf %34, %36 : vector<2x8x256xf32>
    %38 = arith.addf %33, %37 : vector<2x8x256xf32>
    %cst_7 = arith.constant 0.327104419 : f32
    %39 = vector.broadcast %cst_7 : f32 to vector<2x8x256xf32>
    %40 = arith.mulf %39, %38 : vector<2x8x256xf32>
    %41 = arith.addf %29, %40 : vector<2x8x256xf32>
    %cst_8 = arith.constant 0.345791161 : f32
    %42 = vector.broadcast %cst_8 : f32 to vector<2x8x256xf32>
    %43 = arith.mulf %42, %41 : vector<2x8x256xf32>
    %c16_i32 = arith.constant 16 : i32
    %44 = tpu.dynamic_rotate %41 by %c16_i32 dim 2 : vector<2x8x256xf32>, i32 -> vector<2x8x256xf32>
    %45 = vector.shape_cast %7 : vector<1x256xf32> to vector<1x1x256xf32>
    %46 = vector.broadcast %45 : vector<1x1x256xf32> to vector<2x8x256xf32>
    %47 = arith.mulf %44, %46 : vector<2x8x256xf32>
    %c240_i32 = arith.constant 240 : i32
    %48 = tpu.dynamic_rotate %41 by %c240_i32 dim 2 : vector<2x8x256xf32>, i32 -> vector<2x8x256xf32>
    %49 = vector.shape_cast %3 : vector<1x256xf32> to vector<1x1x256xf32>
    %50 = vector.broadcast %49 : vector<1x1x256xf32> to vector<2x8x256xf32>
    %51 = arith.mulf %48, %50 : vector<2x8x256xf32>
    %52 = arith.addf %47, %51 : vector<2x8x256xf32>
    %cst_9 = arith.constant 0.327104419 : f32
    %53 = vector.broadcast %cst_9 : f32 to vector<2x8x256xf32>
    %54 = arith.mulf %53, %52 : vector<2x8x256xf32>
    %55 = arith.addf %43, %54 : vector<2x8x256xf32>
    %c255_i32_10 = arith.constant 255 : i32
    %56 = tpu.dynamic_rotate %55 by %c255_i32_10 dim 2 : vector<2x8x256xf32>, i32 -> vector<2x8x256xf32>
    %57 = vector.shape_cast %1 : vector<1x256xf32> to vector<1x1x256xf32>
    %58 = vector.broadcast %57 : vector<1x1x256xf32> to vector<2x8x256xf32>
    %59 = arith.mulf %56, %58 : vector<2x8x256xf32>
    %c1_i32_11 = arith.constant 1 : i32
    %60 = tpu.dynamic_rotate %55 by %c1_i32_11 dim 2 : vector<2x8x256xf32>, i32 -> vector<2x8x256xf32>
    %61 = vector.shape_cast %5 : vector<1x256xf32> to vector<1x1x256xf32>
    %62 = vector.broadcast %61 : vector<1x1x256xf32> to vector<2x8x256xf32>
    %63 = arith.mulf %60, %62 : vector<2x8x256xf32>
    %64 = arith.subf %59, %63 : vector<2x8x256xf32>
    %c16_i32_12 = arith.constant 16 : i32
    %65 = tpu.dynamic_rotate %64 by %c16_i32_12 dim 2 : vector<2x8x256xf32>, i32 -> vector<2x8x256xf32>
    %66 = vector.shape_cast %7 : vector<1x256xf32> to vector<1x1x256xf32>
    %67 = vector.broadcast %66 : vector<1x1x256xf32> to vector<2x8x256xf32>
    %68 = arith.mulf %65, %67 : vector<2x8x256xf32>
    %c240_i32_13 = arith.constant 240 : i32
    %69 = tpu.dynamic_rotate %64 by %c240_i32_13 dim 2 : vector<2x8x256xf32>, i32 -> vector<2x8x256xf32>
    %70 = vector.shape_cast %3 : vector<1x256xf32> to vector<1x1x256xf32>
    %71 = vector.broadcast %70 : vector<1x1x256xf32> to vector<2x8x256xf32>
    %72 = arith.mulf %69, %71 : vector<2x8x256xf32>
    %73 = arith.addf %68, %72 : vector<2x8x256xf32>
    %cst_14 = arith.constant 5.000000e-01 : f32
    %74 = vector.broadcast %cst_14 : f32 to vector<2x8x256xf32>
    %75 = arith.mulf %74, %73 : vector<2x8x256xf32>
    %76 = arith.addf %64, %75 : vector<2x8x256xf32>
    %c240_i32_15 = arith.constant 240 : i32
    %77 = tpu.dynamic_rotate %55 by %c240_i32_15 dim 2 : vector<2x8x256xf32>, i32 -> vector<2x8x256xf32>
    %78 = vector.shape_cast %3 : vector<1x256xf32> to vector<1x1x256xf32>
    %79 = vector.broadcast %78 : vector<1x1x256xf32> to vector<2x8x256xf32>
    %80 = arith.mulf %77, %79 : vector<2x8x256xf32>
    %c16_i32_16 = arith.constant 16 : i32
    %81 = tpu.dynamic_rotate %55 by %c16_i32_16 dim 2 : vector<2x8x256xf32>, i32 -> vector<2x8x256xf32>
    %82 = vector.shape_cast %7 : vector<1x256xf32> to vector<1x1x256xf32>
    %83 = vector.broadcast %82 : vector<1x1x256xf32> to vector<2x8x256xf32>
    %84 = arith.mulf %81, %83 : vector<2x8x256xf32>
    %85 = arith.subf %80, %84 : vector<2x8x256xf32>
    %c1_i32_17 = arith.constant 1 : i32
    %86 = tpu.dynamic_rotate %85 by %c1_i32_17 dim 2 : vector<2x8x256xf32>, i32 -> vector<2x8x256xf32>
    %87 = vector.shape_cast %5 : vector<1x256xf32> to vector<1x1x256xf32>
    %88 = vector.broadcast %87 : vector<1x1x256xf32> to vector<2x8x256xf32>
    %89 = arith.mulf %86, %88 : vector<2x8x256xf32>
    %c255_i32_18 = arith.constant 255 : i32
    %90 = tpu.dynamic_rotate %85 by %c255_i32_18 dim 2 : vector<2x8x256xf32>, i32 -> vector<2x8x256xf32>
    %91 = vector.shape_cast %1 : vector<1x256xf32> to vector<1x1x256xf32>
    %92 = vector.broadcast %91 : vector<1x1x256xf32> to vector<2x8x256xf32>
    %93 = arith.mulf %90, %92 : vector<2x8x256xf32>
    %94 = arith.addf %89, %93 : vector<2x8x256xf32>
    %cst_19 = arith.constant 5.000000e-01 : f32
    %95 = vector.broadcast %cst_19 : f32 to vector<2x8x256xf32>
    %96 = arith.mulf %95, %94 : vector<2x8x256xf32>
    %97 = arith.addf %85, %96 : vector<2x8x256xf32>
    %cst_20 = arith.constant 1.000000e-10 : f32
    %98 = vector.broadcast %cst_20 : f32 to vector<2x8x256xf32>
    %99 = arith.addf %76, %98 : vector<2x8x256xf32>
    %100 = arith.mulf %99, %99 : vector<2x8x256xf32>
    %cst_21 = arith.constant 1.000000e-10 : f32
    %101 = vector.broadcast %cst_21 : f32 to vector<2x8x256xf32>
    %102 = arith.addf %97, %101 : vector<2x8x256xf32>
    %103 = arith.mulf %102, %102 : vector<2x8x256xf32>
    %104 = arith.addf %100, %103 : vector<2x8x256xf32>
    %105 = math.sqrt %104 : vector<2x8x256xf32>
    %106 = vector.extract_strided_slice %105 {offsets = [0, 0, 0], sizes = [2, 1, 256], strides = [1, 1, 1]} : vector<2x8x256xf32> to vector<2x1x256xf32>
    %107 = vector.shape_cast %106 : vector<2x1x256xf32> to vector<2x256xf32>
    %c255_i32_22 = arith.constant 255 : i32
    %108 = tpu.dynamic_rotate %107 by %c255_i32_22 dim 1 : vector<2x256xf32>, i32 -> vector<2x256xf32>
    %109 = vector.broadcast %1 : vector<1x256xf32> to vector<2x256xf32>
    %110 = arith.mulf %108, %109 : vector<2x256xf32>
    %c1_i32_23 = arith.constant 1 : i32
    %111 = tpu.dynamic_rotate %107 by %c1_i32_23 dim 1 : vector<2x256xf32>, i32 -> vector<2x256xf32>
    %112 = vector.broadcast %5 : vector<1x256xf32> to vector<2x256xf32>
    %113 = arith.mulf %111, %112 : vector<2x256xf32>
    %114 = arith.maximumf %110, %113 : vector<2x256xf32>
    %115 = arith.subf %107, %114 : vector<2x256xf32>
    %c239_i32 = arith.constant 239 : i32
    %116 = tpu.dynamic_rotate %107 by %c239_i32 dim 1 : vector<2x256xf32>, i32 -> vector<2x256xf32>
    %117 = vector.broadcast %2 : vector<1x256xf32> to vector<2x256xf32>
    %118 = arith.mulf %116, %117 : vector<2x256xf32>
    %c17_i32 = arith.constant 17 : i32
    %119 = tpu.dynamic_rotate %107 by %c17_i32 dim 1 : vector<2x256xf32>, i32 -> vector<2x256xf32>
    %120 = vector.broadcast %6 : vector<1x256xf32> to vector<2x256xf32>
    %121 = arith.mulf %119, %120 : vector<2x256xf32>
    %122 = arith.maximumf %118, %121 : vector<2x256xf32>
    %123 = arith.subf %107, %122 : vector<2x256xf32>
    %c240_i32_24 = arith.constant 240 : i32
    %124 = tpu.dynamic_rotate %107 by %c240_i32_24 dim 1 : vector<2x256xf32>, i32 -> vector<2x256xf32>
    %125 = vector.broadcast %3 : vector<1x256xf32> to vector<2x256xf32>
    %126 = arith.mulf %124, %125 : vector<2x256xf32>
    %c16_i32_25 = arith.constant 16 : i32
    %127 = tpu.dynamic_rotate %107 by %c16_i32_25 dim 1 : vector<2x256xf32>, i32 -> vector<2x256xf32>
    %128 = vector.broadcast %7 : vector<1x256xf32> to vector<2x256xf32>
    %129 = arith.mulf %127, %128 : vector<2x256xf32>
    %130 = arith.maximumf %126, %129 : vector<2x256xf32>
    %131 = arith.subf %107, %130 : vector<2x256xf32>
    %c241_i32 = arith.constant 241 : i32
    %132 = tpu.dynamic_rotate %107 by %c241_i32 dim 1 : vector<2x256xf32>, i32 -> vector<2x256xf32>
    %133 = vector.broadcast %4 : vector<1x256xf32> to vector<2x256xf32>
    %134 = arith.mulf %132, %133 : vector<2x256xf32>
    %c15_i32 = arith.constant 15 : i32
    %135 = tpu.dynamic_rotate %107 by %c15_i32 dim 1 : vector<2x256xf32>, i32 -> vector<2x256xf32>
    %136 = vector.broadcast %8 : vector<1x256xf32> to vector<2x256xf32>
    %137 = arith.mulf %135, %136 : vector<2x256xf32>
    %138 = arith.maximumf %134, %137 : vector<2x256xf32>
    %139 = arith.subf %107, %138 : vector<2x256xf32>
    %cst_26 = arith.constant 1.000000e-10 : f32
    %140 = vector.broadcast %cst_26 : f32 to vector<2x8x256xf32>
    %141 = arith.addf %97, %140 : vector<2x8x256xf32>
    %cst_27 = arith.constant 1.000000e-10 : f32
    %142 = vector.broadcast %cst_27 : f32 to vector<2x8x256xf32>
    %143 = arith.addf %76, %142 : vector<2x8x256xf32>
    %144 = arith.divf %141, %143 : vector<2x8x256xf32>
    %cst_28 = arith.constant 1.227600e+00 : f32
    %145 = vector.broadcast %cst_28 : f32 to vector<2x8x256xf32>
    %146 = arith.mulf %145, %144 : vector<2x8x256xf32>
    %147 = arith.negf %146 : vector<2x8x256xf32>
    %148 = math.exp %147 : vector<2x8x256xf32>
    %cst_29 = arith.constant 1.000000e+00 : f32
    %149 = vector.broadcast %cst_29 : f32 to vector<2x8x256xf32>
    %150 = arith.addf %149, %148 : vector<2x8x256xf32>
    %151 = arith.divf %149, %150 : vector<2x8x256xf32>
    %cst_30 = arith.constant 2.714000e-01 : f32
    %152 = vector.broadcast %cst_30 : f32 to vector<2x8x256xf32>
    %153 = arith.mulf %152, %144 : vector<2x8x256xf32>
    %154 = math.tanh %153 : vector<2x8x256xf32>
    %cst_31 = arith.constant 1.57079637 : f32
    %155 = vector.broadcast %cst_31 : f32 to vector<2x8x256xf32>
    %156 = arith.mulf %155, %154 : vector<2x8x256xf32>
    %cst_32 = arith.constant 1.802200e+00 : f32
    %157 = vector.broadcast %cst_32 : f32 to vector<2x8x256xf32>
    %158 = arith.mulf %157, %146 : vector<2x8x256xf32>
    %159 = arith.mulf %158, %151 : vector<2x8x256xf32>
    %cst_33 = arith.constant 1.000000e+00 : f32
    %160 = vector.broadcast %cst_33 : f32 to vector<2x8x256xf32>
    %161 = arith.subf %160, %151 : vector<2x8x256xf32>
    %162 = arith.mulf %159, %161 : vector<2x8x256xf32>
    %163 = arith.addf %156, %162 : vector<2x8x256xf32>
    %cst_34 = arith.constant 57.2957802 : f32
    %164 = vector.broadcast %cst_34 : f32 to vector<2x8x256xf32>
    %165 = arith.mulf %163, %164 : vector<2x8x256xf32>
    %cst_35 = arith.constant 4.500000e+01 : f32
    %166 = vector.broadcast %cst_35 : f32 to vector<2x8x256xf32>
    %167 = arith.divf %165, %166 : vector<2x8x256xf32>
    %168 = math.roundeven %167 : vector<2x8x256xf32>
    %cst_36 = arith.constant 2.500000e-01 : f32
    %169 = vector.broadcast %cst_36 : f32 to vector<2x8x256xf32>
    %170 = arith.mulf %168, %169 : vector<2x8x256xf32>
    %171 = math.floor %170 : vector<2x8x256xf32>
    %cst_37 = arith.constant 4.000000e+00 : f32
    %172 = vector.broadcast %cst_37 : f32 to vector<2x8x256xf32>
    %173 = arith.mulf %172, %171 : vector<2x8x256xf32>
    %174 = arith.subf %168, %173 : vector<2x8x256xf32>
    %175 = arith.fptosi %174 : vector<2x8x256xf32> to vector<2x8x256xi32>
    %c0_i32 = arith.constant 0 : i32
    %176 = vector.broadcast %c0_i32 : i32 to vector<2x8x256xi32>
    %177 = arith.cmpi eq, %175, %176 : vector<2x8x256xi32>
    %178 = vector.shape_cast %115 : vector<2x256xf32> to vector<2x1x256xf32>
    %cst_38 = arith.constant 0.000000e+00 : f32
    %179 = vector.shape_cast %178 : vector<2x1x256xf32> to vector<2x1x256xf32>
    %180 = vector.broadcast %179 : vector<2x1x256xf32> to vector<2x8x256xf32>
    %181 = vector.broadcast %cst_38 : f32 to vector<2x8x256xf32>
    %182 = arith.select %177, %180, %181 : vector<2x8x256xi1>, vector<2x8x256xf32>
    %c1_i32_39 = arith.constant 1 : i32
    %183 = vector.broadcast %c1_i32_39 : i32 to vector<2x8x256xi32>
    %184 = arith.cmpi eq, %175, %183 : vector<2x8x256xi32>
    %185 = vector.shape_cast %123 : vector<2x256xf32> to vector<2x1x256xf32>
    %cst_40 = arith.constant 0.000000e+00 : f32
    %186 = vector.shape_cast %185 : vector<2x1x256xf32> to vector<2x1x256xf32>
    %187 = vector.broadcast %186 : vector<2x1x256xf32> to vector<2x8x256xf32>
    %188 = vector.broadcast %cst_40 : f32 to vector<2x8x256xf32>
    %189 = arith.select %184, %187, %188 : vector<2x8x256xi1>, vector<2x8x256xf32>
    %190 = arith.addf %182, %189 : vector<2x8x256xf32>
    %c2_i32 = arith.constant 2 : i32
    %191 = vector.broadcast %c2_i32 : i32 to vector<2x8x256xi32>
    %192 = arith.cmpi eq, %175, %191 : vector<2x8x256xi32>
    %193 = vector.shape_cast %131 : vector<2x256xf32> to vector<2x1x256xf32>
    %cst_41 = arith.constant 0.000000e+00 : f32
    %194 = vector.shape_cast %193 : vector<2x1x256xf32> to vector<2x1x256xf32>
    %195 = vector.broadcast %194 : vector<2x1x256xf32> to vector<2x8x256xf32>
    %196 = vector.broadcast %cst_41 : f32 to vector<2x8x256xf32>
    %197 = arith.select %192, %195, %196 : vector<2x8x256xi1>, vector<2x8x256xf32>
    %198 = arith.addf %190, %197 : vector<2x8x256xf32>
    %c3_i32 = arith.constant 3 : i32
    %199 = vector.broadcast %c3_i32 : i32 to vector<2x8x256xi32>
    %200 = arith.cmpi eq, %175, %199 : vector<2x8x256xi32>
    %201 = vector.shape_cast %139 : vector<2x256xf32> to vector<2x1x256xf32>
    %cst_42 = arith.constant 0.000000e+00 : f32
    %202 = vector.shape_cast %201 : vector<2x1x256xf32> to vector<2x1x256xf32>
    %203 = vector.broadcast %202 : vector<2x1x256xf32> to vector<2x8x256xf32>
    %204 = vector.broadcast %cst_42 : f32 to vector<2x8x256xf32>
    %205 = arith.select %200, %203, %204 : vector<2x8x256xi1>, vector<2x8x256xf32>
    %206 = arith.addf %198, %205 : vector<2x8x256xf32>
    %cst_43 = arith.constant 0.000000e+00 : f32
    %207 = vector.broadcast %cst_43 : f32 to vector<2x8x256xf32>
    %208 = arith.cmpf ogt, %206, %207 : vector<2x8x256xf32>
    %cst_44 = arith.constant 0.000000e+00 : f32
    %209 = vector.broadcast %cst_44 : f32 to vector<2x8x256xf32>
    %210 = arith.select %208, %105, %209 : vector<2x8x256xi1>, vector<2x8x256xf32>
    %211 = vector.shape_cast %210 : vector<2x8x256xf32> to vector<1x2x8x256xf32>
    %cst_45 = arith.constant dense<0xFF800000> : vector<1xf32>
    %212 = vector.multi_reduction <maximumf>, %211, %cst_45 [1, 2, 3] : vector<1x2x8x256xf32> to vector<1xf32>
    %213 = vector.shape_cast %212 : vector<1xf32> to vector<1x1x1x1xf32>
    %214 = vector.extract %213[0, 0, 0, 0] : f32 from vector<1x1x1x1xf32>
    %215 = vector.broadcast %214 : f32 to vector<2x8x256xf32>
    %216 = arith.divf %210, %215 : vector<2x8x256xf32>
    %cst_46 = arith.constant 2.000000e-01 : f32
    %217 = vector.broadcast %cst_46 : f32 to vector<2x8x256xf32>
    %218 = arith.subf %216, %217 : vector<2x8x256xf32>
    %cst_47 = arith.constant 1.000000e+03 : f32
    %219 = vector.broadcast %cst_47 : f32 to vector<2x8x256xf32>
    %220 = arith.mulf %219, %218 : vector<2x8x256xf32>
    %221 = arith.negf %220 : vector<2x8x256xf32>
    %222 = math.exp %221 : vector<2x8x256xf32>
    %cst_48 = arith.constant 1.000000e+00 : f32
    %223 = vector.broadcast %cst_48 : f32 to vector<2x8x256xf32>
    %224 = arith.addf %223, %222 : vector<2x8x256xf32>
    %225 = arith.divf %223, %224 : vector<2x8x256xf32>
    %cst_49 = arith.constant 1.000000e-01 : f32
    %226 = vector.broadcast %cst_49 : f32 to vector<2x8x256xf32>
    %227 = arith.subf %216, %226 : vector<2x8x256xf32>
    %cst_50 = arith.constant 1.000000e+03 : f32
    %228 = vector.broadcast %cst_50 : f32 to vector<2x8x256xf32>
    %229 = arith.mulf %228, %227 : vector<2x8x256xf32>
    %230 = arith.negf %229 : vector<2x8x256xf32>
    %231 = math.exp %230 : vector<2x8x256xf32>
    %cst_51 = arith.constant 1.000000e+00 : f32
    %232 = vector.broadcast %cst_51 : f32 to vector<2x8x256xf32>
    %233 = arith.addf %232, %231 : vector<2x8x256xf32>
    %234 = arith.divf %232, %233 : vector<2x8x256xf32>
    %235 = arith.addf %225, %234 : vector<2x8x256xf32>
    %cst_52 = arith.constant 5.000000e-01 : f32
    %236 = vector.broadcast %cst_52 : f32 to vector<2x8x256xf32>
    %237 = arith.mulf %236, %235 : vector<2x8x256xf32>
    %cst_53 = arith.constant dense<0.000000e+00> : vector<2x256xf32>
    %238 = vector.multi_reduction <add>, %237, %cst_53 [1] : vector<2x8x256xf32> to vector<2x256xf32>
    %cst_54 = arith.constant 0.000000e+00 : f32
    %cst_55 = arith.constant 1.000000e+00 : f32
    %239 = vector.broadcast %cst_54 : f32 to vector<2x256xf32>
    %240 = arith.maximumf %239, %238 : vector<2x256xf32>
    %241 = vector.broadcast %cst_55 : f32 to vector<2x256xf32>
    %242 = arith.minimumf %241, %240 : vector<2x256xf32>
    %c0_56 = arith.constant 0 : index
    %c0_57 = arith.constant 0 : index
    %243 = vector.load %arg4[%c0_56, %c0_57] : memref<2x256xf32, #tpu.memory_space<vmem>>, vector<2x256xf32>
    tpu.vector_store %arg4[%c0_56, %c0_57], %242 {strides = array<i32>} : memref<2x256xf32, #tpu.memory_space<vmem>>, vector<2x256xf32>,
    return
  }
  func.func @transform_0(%arg0: i32) -> (i32, i32, i32) {
    %c0_i32 = arith.constant 0 : i32
    %c0_i32_0 = arith.constant 0 : i32
    %c0_i32_1 = arith.constant 0 : i32
    %c0_i32_2 = arith.constant 0 : i32
    return %c0_i32, %c0_i32_0, %c0_i32_1 : i32, i32, i32
  }
  func.func @transform_1(%arg0: i32) -> (i32, i32) {
    %c0_i32 = arith.constant 0 : i32
    %c0_i32_0 = arith.constant 0 : i32
    %c0_i32_1 = arith.constant 0 : i32
    return %c0_i32, %c0_i32_0 : i32, i32
  }
  func.func @transform_2(%arg0: i32) -> (i32, i32, i32) {
    %c0_i32 = arith.constant 0 : i32
    %c0_i32_0 = arith.constant 0 : i32
    %c0_i32_1 = arith.constant 0 : i32
    %c0_i32_2 = arith.constant 0 : i32
    return %c0_i32, %c0_i32_0, %c0_i32_1 : i32, i32, i32
  }
  func.func @transform_3(%arg0: i32) -> (i32, i32) {
    %c0_i32 = arith.constant 0 : i32
    %c0_i32_0 = arith.constant 0 : i32
    %c0_i32_1 = arith.constant 0 : i32
    return %c0_i32, %c0_i32_0 : i32, i32
  }
}

</mosaic_0001>

<bundles_post_ra>
// kernel: canny_forward.1
= control target key start
LH: loop header
LB: loop body
LE: loop exit
PB: predicated region body
PF: predicated region fallthrough
CT: control target
= control target key end

     0   :  { %v1172_v0 = vmov 0   ;;  %v28_v4 = vlaneseq  ;;  %s1174_s21 = smov 127   ;;  %s1176_s26 = smov 112   ;;  %vm513_vm8 = vcmask 1041409   ;;  %s1752_s0 = inlined_call_operand.vmem [shape: f32[3,8,1], index: 0, kind: input, shape index: {}]   ;;  %s1753_s2 = inlined_call_operand.vmem [shape: f32[2,3,256], index: 2, kind: input, shape index: {}]   ;;  %s1754_s1 = inlined_call_operand.vmem [shape: f32[8,256], index: 1, kind: input, shape index: {}]   ;;  %s1755_s3 = inlined_call_operand.vmem [shape: f32[2,256], index: 3, kind: output, shape index: {}]  }
   0x1   :  { %1096 = vset.pattern.permute.xlu0 %v1172_v0  ;;  %v18_v1 = vld [vmem:[%s1752_s0] sm:$0xff]  ;;  %1097 = vset.pattern.permute.xlu1 %v1172_v0  ;;  %v20_v2 = vld [vmem:[%s1752_s0 + $0x10] sm:$0xff]  ;;  %v19_v3 = vld [vmem:[%s1752_s0 + $0x8] sm:$0xff]  ;;  %s1177_s27 = smov 111   ;;  %s1178_s28 = smov 17  }
   0x2   :  { %23 = vperm.xlu0 %1096, %v18_v1   ;;  %119 = vperm.xlu1 %1097, %v20_v2   ;;  %v1212_v5 = vshrl.u32 %v28_v4, 7  ;;  %v17_v8 = vld [vmem:[%s1753_s2 + $0x8] sm:$0x77]  ;;  %v16_v19 = vld [vmem:[%s1753_s2] sm:$0x77]  ;;  %s1173_s2 = smov 1  }
   0x3   :  { %v1271_v61 = vand.u32 127, %v28_v4  ;;  %v1276_v62 = vld [vmem:[%s1754_s1] sm:$0xff]  ;;  %v1281_v63 = vld [vmem:[%s1754_s1 + $0x8] sm:$0xff]  ;;  %s1175_s1 = smov 16   ;;  %s1179_s29 = smov 113  }
   0x4   :  { %v1215_v6 = vsub.s32 0, %v1212_v5  ;;  %v1218_v7 = vsub.s32 4, %v1212_v5  ;;  %v1224_v9 = vsub.s32 1, %v1212_v5  ;;  %v1227_v10 = vsub.s32 5, %v1212_v5  ;;  %s1180_s30 = smov 15  }
   0x5   :  { %v1230_v11 = vsub.s32 2, %v1212_v5  ;;  %v1233_v12 = vsub.s32 6, %v1212_v5  ;;  %vm180_vm0 = vcmp.lt.s32.totalorder %v1271_v61, 1  ;;  %vm205_vm1 = vcmp.lt.s32.totalorder %v1271_v61, 127 }
   0x6   :  { %70 = vperm.xlu0 %1096, %v19_v3   ;;  %v39_v13 = vrot.slane %v17_v8, %v1215_v6  ;;  %v43_v14 = vrot.slane %v17_v8, %v1218_v7  ;;  %v84_v15 = vrot.slane %v17_v8, %v1224_v9  ;;  %v88_v16 = vrot.slane %v17_v8, %v1227_v10 }
   0x7   :  { %v133_v17 = vrot.slane %v17_v8, %v1230_v11  ;;  %v137_v18 = vrot.slane %v17_v8, %v1233_v12  ;;  %v76_v20 = vrot.slane %v16_v19, %v1224_v9  ;;  %v80_v21 = vrot.slane %v16_v19, %v1227_v10 }
   0x8   :  { %v59_v22 = vrot.slane %v39_v13, %v1215_v6  ;;  %v63_v23 = vrot.slane %v43_v14, %v1215_v6  ;;  %v104_v25 = vrot.slane %v84_v15, %v1224_v9  ;;  %v108_v26 = vrot.slane %v88_v16, %v1224_v9 }
   0x9   :  { %v153_v27 = vrot.slane %v133_v17, %v1230_v11  ;;  %v157_v28 = vrot.slane %v137_v18, %v1230_v11  ;;  %v31_v30 = vrot.slane %v16_v19, %v1215_v6  ;;  %v35_v31 = vrot.slane %v16_v19, %v1218_v7 }
   0xa   :  { %v96_v32 = vrot.slane %v76_v20, %v1224_v9  ;;  %v100_v33 = vrot.slane %v80_v21, %v1224_v9  ;;  %v125_v37 = vrot.slane %v16_v19, %v1230_v11  ;;  %v129_v38 = vrot.slane %v16_v19, %v1233_v12 }
   0xb   :  { %v51_v43 = vrot.slane %v31_v30, %v1215_v6  ;;  %v55_v44 = vrot.slane %v35_v31, %v1215_v6  ;;  %v1286_v2 = vrot.slane %v1276_v62, %v1218_v7  ;;  %v1290_v3 = vrot.slane %v1281_v63, %v1218_v7 }
   0xc   :  { %v145_v47 = vrot.slane %v125_v37, %v1230_v11  ;;  %v149_v48 = vrot.slane %v129_v38, %v1230_v11  ;;  %v1295_v4 = vrot.slane %v1276_v62, %v1215_v6  ;;  %v1299_v8 = vrot.slane %v1281_v63, %v1215_v6 }
   0xd   :  { %vm246_vm2 = vcmp.lt.s32.totalorder %v1271_v61, 16  ;;  %vm271_vm3 = vcmp.lt.s32.totalorder %v1271_v61, 112  ;;  %vm553_vm13 = vcmp.lt.s32.totalorder %v1271_v61, 111  ;;  %vm570_vm14 = vcmp.lt.s32.totalorder %v1271_v61, 17 }
   0xe   :  { %vm631_vm15 = vcmp.lt.s32.totalorder %v1271_v61, 113 }
  0x81   :  { %v24_v24 = vpop.permute.xlu0 %23  ;;  %v120_v29 = vpop.permute.xlu1 %119 }
  0x82   :  { %v66_v34 = vmul.f32 %v59_v22, %v24_v24  ;;  %v67_v35 = vmul.f32 %v63_v23, %v24_v24  ;;  %v160_v41 = vmul.f32 %v153_v27, %v120_v29  ;;  %v161_v42 = vmul.f32 %v157_v28, %v120_v29 }
  0x83   :  { %v64_v53 = vmul.f32 %v51_v43, %v24_v24  ;;  %v65_v54 = vmul.f32 %v55_v44, %v24_v24  ;;  %v158_v55 = vmul.f32 %v145_v47, %v120_v29  ;;  %v159_v56 = vmul.f32 %v149_v48, %v120_v29 }
  0x85   :  { %v71_v36 = vpop.permute.xlu0 %70 }
  0x86   :  { %v111_v39 = vmul.f32 %v104_v25, %v71_v36  ;;  %v112_v40 = vmul.f32 %v108_v26, %v71_v36  ;;  %v109_v49 = vmul.f32 %v96_v32, %v71_v36  ;;  %v110_v50 = vmul.f32 %v100_v33, %v71_v36 }
  0x88   :  { %v116_v45 = vadd.f32 %v112_v40, %v67_v35  ;;  %v115_v46 = vadd.f32 %v111_v39, %v66_v34  ;;  %v114_v57 = vadd.f32 %v110_v50, %v65_v54  ;;  %v113_v58 = vadd.f32 %v109_v49, %v64_v53 }
  0x89   :  { %v1340_v53 = vrot.slane %v1281_v63, %v1233_v12  ;;  %v1345_v54 = vrot.slane %v1276_v62, %v1230_v11 }
  0x8a   :  { %v165_v51 = vadd.f32 %v161_v42, %v116_v45  ;;  %v164_v52 = vadd.f32 %v160_v41, %v115_v46  ;;  %v163_v59 = vadd.f32 %v159_v56, %v114_v57  ;;  %v162_v60 = vadd.f32 %v158_v55, %v113_v58 }
  0x8b   :  { %v1349_v55 = vrot.slane %v1281_v63, %v1230_v11 }
  0x8c   :  { %176 = vrot.lane.b32.xlu0 %v165_v51, %s1173_s2  ;;  %172 = vrot.lane.b32.xlu1 %v164_v52, %s1173_s2  ;;  %v169_v26 = vmul.f32 0.34579116, %v165_v51  ;;  %v168_v30 = vmul.f32 0.34579116, %v164_v52  ;;  %v167_v44 = vmul.f32 0.34579116, %v163_v59 }
  0x8d   :  { %v166_v47 = vmul.f32 0.34579116, %v162_v60 }
  0x90   :  { %203 = vrot.lane.b32.xlu0 %v165_v51, %s1174_s21  ;;  %199 = vrot.lane.b32.xlu1 %v164_v52, %s1174_s21  ;;  %v1336_v52 = vrot.slane %v1276_v62, %v1233_v12 }
  0x94   :  { %174 = vrot.lane.b32.xlu0 %v163_v59, %s1173_s2  ;;  %170 = vrot.lane.b32.xlu1 %v162_v60, %s1173_s2 }
  0x98   :  { %201 = vrot.lane.b32.xlu0 %v163_v59, %s1174_s21  ;;  %197 = vrot.lane.b32.xlu1 %v162_v60, %s1174_s21 }
  0xfe   :  { %v177_v0 = vpop.permute.xlu0 %176  ;;  %v173_v1 = vpop.permute.xlu1 %172 }
  0xff   :  { %v182_v13 = vsel %vm180_vm0, %v173_v1, %v177_v0  ;;  %v184_v14 = vsel %vm180_vm0, %v177_v0, %v173_v1 }
 0x100   :  { %v195_v18 = vmul.f32 %v1286_v2, %v184_v14  ;;  %v196_v19 = vmul.f32 %v1290_v3, %v182_v13 }
 0x102   :  { %v204_v15 = vpop.permute.xlu0 %203  ;;  %v200_v16 = vpop.permute.xlu1 %199 }
 0x103   :  { %v207_v7 = vsel %vm205_vm1, %v200_v16, %v204_v15  ;;  %v209_v17 = vsel %vm205_vm1, %v204_v15, %v200_v16 }
 0x104   :  { %v220_v20 = vmul.f32 %v1295_v4, %v207_v7  ;;  %v221_v21 = vmul.f32 %v1299_v8, %v209_v17 }
 0x106   :  { %v224_v22 = vadd.f32 %v220_v20, %v195_v18  ;;  %v225_v23 = vadd.f32 %v221_v21, %v196_v19  ;;  %v175_v24 = vpop.permute.xlu0 %174  ;;  %v171_v25 = vpop.permute.xlu1 %170 }
 0x107   :  { %v183_v29 = vsel %vm180_vm0, %v175_v24, %v171_v25  ;;  %v181_v31 = vsel %vm180_vm0, %v171_v25, %v175_v24 }
 0x108   :  { %v228_v27 = vmul.f32 0.32710442, %v224_v22  ;;  %v229_v28 = vmul.f32 0.32710442, %v225_v23  ;;  %v193_v36 = vmul.f32 %v1286_v2, %v183_v29  ;;  %v194_v39 = vmul.f32 %v1290_v3, %v181_v31 }
 0x10a   :  { %v202_v32 = vpop.permute.xlu0 %201  ;;  %v198_v33 = vpop.permute.xlu1 %197  ;;  %v233_v34 = vadd.f32 %v229_v28, %v169_v26  ;;  %v232_v35 = vadd.f32 %v228_v27, %v168_v30 }
 0x10b   :  { %v206_v37 = vsel %vm205_vm1, %v198_v33, %v202_v32  ;;  %v208_v38 = vsel %vm205_vm1, %v202_v32, %v198_v33 }
 0x10c   :  { %v218_v40 = vmul.f32 %v1295_v4, %v206_v37  ;;  %v219_v41 = vmul.f32 %v1299_v8, %v208_v38  ;;  %244 = vrot.lane.b32.xlu0 %v233_v34, %s1175_s1  ;;  %240 = vrot.lane.b32.xlu1 %v232_v35, %s1175_s1  ;;  %v237_v17 = vmul.f32 0.34579116, %v233_v34  ;;  %v236_v18 = vmul.f32 0.34579116, %v232_v35 }
 0x10e   :  { %v222_v42 = vadd.f32 %v218_v40, %v193_v36  ;;  %v223_v43 = vadd.f32 %v219_v41, %v194_v39 }
 0x110   :  { %v226_v45 = vmul.f32 0.32710442, %v222_v42  ;;  %v227_v46 = vmul.f32 0.32710442, %v223_v43  ;;  %269 = vrot.lane.b32.xlu0 %v233_v34, %s1176_s26  ;;  %265 = vrot.lane.b32.xlu1 %v232_v35, %s1176_s26 }
 0x112   :  { %v231_v48 = vadd.f32 %v227_v46, %v167_v44  ;;  %v230_v49 = vadd.f32 %v226_v45, %v166_v47 }
 0x114   :  { %242 = vrot.lane.b32.xlu0 %v231_v48, %s1175_s1  ;;  %238 = vrot.lane.b32.xlu1 %v230_v49, %s1175_s1  ;;  %v235_v37 = vmul.f32 0.34579116, %v231_v48  ;;  %v234_v38 = vmul.f32 0.34579116, %v230_v49 }
 0x118   :  { %267 = vrot.lane.b32.xlu0 %v231_v48, %s1176_s26  ;;  %263 = vrot.lane.b32.xlu1 %v230_v49, %s1176_s26 }
 0x17e   :  { %v245_v50 = vpop.permute.xlu0 %244  ;;  %v241_v51 = vpop.permute.xlu1 %240 }
 0x17f   :  { %v248_v56 = vsel %vm246_vm2, %v241_v51, %v245_v50  ;;  %v250_v57 = vsel %vm246_vm2, %v245_v50, %v241_v51 }
 0x180   :  { %v261_v0 = vmul.f32 %v1336_v52, %v250_v57  ;;  %v262_v1 = vmul.f32 %v1340_v53, %v248_v56 }
 0x182   :  { %v270_v58 = vpop.permute.xlu0 %269  ;;  %v266_v59 = vpop.permute.xlu1 %265 }
 0x183   :  { %v273_v12 = vsel %vm271_vm3, %v266_v59, %v270_v58  ;;  %v275_v60 = vsel %vm271_vm3, %v270_v58, %v266_v59 }
 0x184   :  { %v286_v11 = vmul.f32 %v1345_v54, %v273_v12  ;;  %v287_v13 = vmul.f32 %v1349_v55, %v275_v60 }
 0x186   :  { %v290_v14 = vadd.f32 %v286_v11, %v261_v0  ;;  %v291_v15 = vadd.f32 %v287_v13, %v262_v1  ;;  %v243_v16 = vpop.permute.xlu0 %242  ;;  %v239_v7 = vpop.permute.xlu1 %238 }
 0x187   :  { %v247_v27 = vsel %vm246_vm2, %v239_v7, %v243_v16  ;;  %v249_v28 = vsel %vm246_vm2, %v243_v16, %v239_v7 }
 0x188   :  { %v294_v19 = vmul.f32 0.32710442, %v290_v14  ;;  %v295_v20 = vmul.f32 0.32710442, %v291_v15  ;;  %v259_v31 = vmul.f32 %v1336_v52, %v249_v28  ;;  %v260_v32 = vmul.f32 %v1340_v53, %v247_v27 }
 0x18a   :  { %v298_v21 = vadd.f32 %v294_v19, %v236_v18  ;;  %v299_v22 = vadd.f32 %v295_v20, %v237_v17  ;;  %v268_v23 = vpop.permute.xlu0 %267  ;;  %v264_v24 = vpop.permute.xlu1 %263 }
 0x18b   :  { %v272_v25 = vsel %vm271_vm3, %v264_v24, %v268_v23  ;;  %v274_v26 = vsel %vm271_vm3, %v268_v23, %v264_v24 }
 0x18c   :  { %306 = vrot.lane.b32.xlu0 %v299_v22, %s1174_s21  ;;  %302 = vrot.lane.b32.xlu1 %v298_v21, %s1174_s21  ;;  %v284_v29 = vmul.f32 %v1345_v54, %v272_v25  ;;  %v285_v30 = vmul.f32 %v1349_v55, %v274_v26 }
 0x18e   :  { %v288_v33 = vadd.f32 %v284_v29, %v259_v31  ;;  %v289_v34 = vadd.f32 %v285_v30, %v260_v32 }
 0x190   :  { %322 = vrot.lane.b32.xlu0 %v299_v22, %s1173_s2  ;;  %318 = vrot.lane.b32.xlu1 %v298_v21, %s1173_s2  ;;  %v292_v35 = vmul.f32 0.32710442, %v288_v33  ;;  %v293_v36 = vmul.f32 0.32710442, %v289_v34 }
 0x192   :  { %v296_v39 = vadd.f32 %v292_v35, %v234_v38  ;;  %v297_v40 = vadd.f32 %v293_v36, %v235_v37 }
 0x194   :  { %386 = vrot.lane.b32.xlu0 %v299_v22, %s1176_s26  ;;  %382 = vrot.lane.b32.xlu1 %v298_v21, %s1176_s26 }
 0x198   :  { %402 = vrot.lane.b32.xlu0 %v299_v22, %s1175_s1  ;;  %398 = vrot.lane.b32.xlu1 %v298_v21, %s1175_s1 }
 0x19c   :  { %304 = vrot.lane.b32.xlu0 %v297_v40, %s1174_s21  ;;  %300 = vrot.lane.b32.xlu1 %v296_v39, %s1174_s21 }
 0x1a0   :  { %320 = vrot.lane.b32.xlu0 %v297_v40, %s1173_s2  ;;  %316 = vrot.lane.b32.xlu1 %v296_v39, %s1173_s2 }
 0x1a4   :  { %384 = vrot.lane.b32.xlu0 %v297_v40, %s1176_s26  ;;  %380 = vrot.lane.b32.xlu1 %v296_v39, %s1176_s26 }
 0x1a8   :  { %400 = vrot.lane.b32.xlu0 %v297_v40, %s1175_s1  ;;  %396 = vrot.lane.b32.xlu1 %v296_v39, %s1175_s1 }
 0x1fe   :  { %v307_v41 = vpop.permute.xlu0 %306  ;;  %v303_v42 = vpop.permute.xlu1 %302 }
 0x1ff   :  { %v309_v43 = vsel %vm205_vm1, %v303_v42, %v307_v41  ;;  %v311_v44 = vsel %vm205_vm1, %v307_v41, %v303_v42 }
 0x200   :  { %v314_v49 = vmul.f32 %v309_v43, %v1295_v4  ;;  %v315_v50 = vmul.f32 %v311_v44, %v1299_v8 }
 0x202   :  { %v323_v45 = vpop.permute.xlu0 %322  ;;  %v319_v46 = vpop.permute.xlu1 %318 }
 0x203   :  { %v325_v47 = vsel %vm180_vm0, %v319_v46, %v323_v45  ;;  %v327_v48 = vsel %vm180_vm0, %v323_v45, %v319_v46 }
 0x204   :  { %v330_v51 = vmul.f32 %v327_v48, %v1286_v2  ;;  %v331_v56 = vmul.f32 %v325_v47, %v1290_v3 }
 0x206   :  { %v387_v57 = vpop.permute.xlu0 %386  ;;  %v383_v58 = vpop.permute.xlu1 %382  ;;  %v1403_v59 = vsub.f32 %v315_v50, %v331_v56  ;;  %v1405_v12 = vsub.f32 %v314_v49, %v330_v51 }
 0x207   :  { %v389_v60 = vsel %vm271_vm3, %v383_v58, %v387_v57  ;;  %v391_v0 = vsel %vm271_vm3, %v387_v57, %v383_v58 }
 0x208   :  { %342 = vrot.lane.b32.xlu0 %v1403_v59, %s1175_s1  ;;  %338 = vrot.lane.b32.xlu1 %v1405_v12, %s1175_s1  ;;  %v394_v13 = vmul.f32 %v389_v60, %v1345_v54  ;;  %v395_v16 = vmul.f32 %v391_v0, %v1349_v55 }
 0x20a   :  { %v403_v1 = vpop.permute.xlu0 %402  ;;  %v399_v11 = vpop.permute.xlu1 %398 }
 0x20b   :  { %v405_v14 = vsel %vm246_vm2, %v399_v11, %v403_v1  ;;  %v407_v15 = vsel %vm246_vm2, %v403_v1, %v399_v11 }
 0x20c   :  { %v410_v7 = vmul.f32 %v407_v15, %v1336_v52  ;;  %v411_v17 = vmul.f32 %v405_v14, %v1340_v53  ;;  %358 = vrot.lane.b32.xlu0 %v1403_v59, %s1176_s26  ;;  %354 = vrot.lane.b32.xlu1 %v1405_v12, %s1176_s26 }
 0x20e   :  { %v305_v18 = vpop.permute.xlu0 %304  ;;  %v301_v19 = vpop.permute.xlu1 %300  ;;  %v1427_v20 = vsub.f32 %v395_v16, %v411_v17  ;;  %v1429_v21 = vsub.f32 %v394_v13, %v410_v7 }
 0x20f   :  { %v308_v22 = vsel %vm205_vm1, %v301_v19, %v305_v18  ;;  %v310_v23 = vsel %vm205_vm1, %v305_v18, %v301_v19 }
 0x210   :  { %422 = vrot.lane.b32.xlu0 %v1427_v20, %s1173_s2  ;;  %418 = vrot.lane.b32.xlu1 %v1429_v21, %s1173_s2  ;;  %v312_v26 = vmul.f32 %v308_v22, %v1295_v4  ;;  %v313_v29 = vmul.f32 %v310_v23, %v1299_v8 }
 0x212   :  { %v321_v24 = vpop.permute.xlu0 %320  ;;  %v317_v25 = vpop.permute.xlu1 %316 }
 0x213   :  { %v324_v27 = vsel %vm180_vm0, %v317_v25, %v321_v24  ;;  %v326_v28 = vsel %vm180_vm0, %v321_v24, %v317_v25 }
 0x214   :  { %v328_v30 = vmul.f32 %v326_v28, %v1286_v2  ;;  %v329_v31 = vmul.f32 %v324_v27, %v1290_v3  ;;  %438 = vrot.lane.b32.xlu0 %v1427_v20, %s1174_s21  ;;  %434 = vrot.lane.b32.xlu1 %v1429_v21, %s1174_s21 }
 0x216   :  { %v385_v32 = vpop.permute.xlu0 %384  ;;  %v381_v33 = vpop.permute.xlu1 %380  ;;  %v1451_v34 = vsub.f32 %v312_v26, %v328_v30  ;;  %v1453_v35 = vsub.f32 %v313_v29, %v329_v31 }
 0x217   :  { %v388_v36 = vsel %vm271_vm3, %v381_v33, %v385_v32  ;;  %v390_v37 = vsel %vm271_vm3, %v385_v32, %v381_v33 }
 0x218   :  { %336 = vrot.lane.b32.xlu1 %v1451_v34, %s1175_s1  ;;  %340 = vrot.lane.b32.xlu0 %v1453_v35, %s1175_s1  ;;  %v392_v40 = vmul.f32 %v388_v36, %v1345_v54  ;;  %v393_v43 = vmul.f32 %v390_v37, %v1349_v55 }
 0x21a   :  { %v401_v38 = vpop.permute.xlu0 %400  ;;  %v397_v39 = vpop.permute.xlu1 %396 }
 0x21b   :  { %v404_v41 = vsel %vm246_vm2, %v397_v39, %v401_v38  ;;  %v406_v42 = vsel %vm246_vm2, %v401_v38, %v397_v39 }
 0x21c   :  { %v408_v44 = vmul.f32 %v406_v42, %v1336_v52  ;;  %v409_v45 = vmul.f32 %v404_v41, %v1340_v53  ;;  %352 = vrot.lane.b32.xlu1 %v1451_v34, %s1176_s26  ;;  %356 = vrot.lane.b32.xlu0 %v1453_v35, %s1176_s26 }
 0x21e   :  { %v1475_v46 = vsub.f32 %v392_v40, %v408_v44  ;;  %v1477_v47 = vsub.f32 %v393_v43, %v409_v45 }
 0x220   :  { %416 = vrot.lane.b32.xlu1 %v1475_v46, %s1173_s2  ;;  %420 = vrot.lane.b32.xlu0 %v1477_v47, %s1173_s2 }
 0x224   :  { %432 = vrot.lane.b32.xlu1 %v1475_v46, %s1174_s21  ;;  %436 = vrot.lane.b32.xlu0 %v1477_v47, %s1174_s21 }
 0x27a   :  { %v343_v48 = vpop.permute.xlu0 %342  ;;  %v339_v49 = vpop.permute.xlu1 %338 }
 0x27b   :  { %v345_v50 = vsel %vm246_vm2, %v339_v49, %v343_v48  ;;  %v347_v51 = vsel %vm246_vm2, %v343_v48, %v339_v49 }
 0x27c   :  { %v350_v0 = vmul.f32 %v347_v51, %v1336_v52  ;;  %v351_v1 = vmul.f32 %v345_v50, %v1340_v53 }
 0x27e   :  { %v359_v56 = vpop.permute.xlu0 %358  ;;  %v355_v57 = vpop.permute.xlu1 %354 }
 0x27f   :  { %v361_v58 = vsel %vm271_vm3, %v355_v57, %v359_v56  ;;  %v363_v60 = vsel %vm271_vm3, %v359_v56, %v355_v57 }
 0x280   :  { %v366_v11 = vmul.f32 %v361_v58, %v1345_v54  ;;  %v367_v13 = vmul.f32 %v363_v60, %v1349_v55 }
 0x282   :  { %v370_v14 = vadd.f32 %v366_v11, %v350_v0  ;;  %v371_v15 = vadd.f32 %v367_v13, %v351_v1  ;;  %v423_v16 = vpop.permute.xlu0 %422  ;;  %v419_v7 = vpop.permute.xlu1 %418 }
 0x283   :  { %v427_v19 = vsel %vm180_vm0, %v423_v16, %v419_v7  ;;  %v425_v24 = vsel %vm180_vm0, %v419_v7, %v423_v16 }
 0x284   :  { %v374_v17 = vmul.f32 0.5, %v370_v14  ;;  %v375_v18 = vmul.f32 0.5, %v371_v15  ;;  %v430_v27 = vmul.f32 %v427_v19, %v1286_v2 }
 0x286   :  { %v378_v22 = vadd.f32 %v374_v17, %v1405_v12  ;;  %v379_v23 = vadd.f32 %v375_v18, %v1403_v59  ;;  %v439_v25 = vpop.permute.xlu0 %438  ;;  %v435_v26 = vpop.permute.xlu1 %434  ;;  %v431_v59 = vmul.f32 %v425_v24, %v1290_v3 }
 0x287   :  { %v441_v28 = vsel %vm205_vm1, %v435_v26, %v439_v25  ;;  %v443_v29 = vsel %vm205_vm1, %v439_v25, %v435_v26 }
 0x288   :  { %v462_v30 = vadd.f32 1e-10, %v378_v22  ;;  %v463_v31 = vadd.f32 1e-10, %v379_v23  ;;  %v446_v32 = vmul.f32 %v441_v28, %v1295_v4  ;;  %v447_v12 = vmul.f32 %v443_v29, %v1299_v8 }
 0x28a   :  { %1098 = vrcp.f32 %v462_v30  ;;  %v450_v33 = vadd.f32 %v446_v32, %v430_v27  ;;  %v341_v36 = vpop.permute.xlu0 %340  ;;  %v337_v37 = vpop.permute.xlu1 %336  ;;  %v451_v38 = vadd.f32 %v447_v12, %v431_v59  ;;  %v466_v23 = vmul.f32 %v462_v30, %v462_v30 }
 0x28b   :  { %1100 = vrcp.f32 %v463_v31  ;;  %v344_v40 = vsel %vm246_vm2, %v337_v37, %v341_v36  ;;  %v346_v41 = vsel %vm246_vm2, %v341_v36, %v337_v37  ;;  %v467_v36 = vmul.f32 %v463_v31, %v463_v31 }
 0x28c   :  { %v454_v39 = vmul.f32 0.5, %v450_v33  ;;  %v455_v42 = vmul.f32 0.5, %v451_v38  ;;  %v348_v50 = vmul.f32 %v346_v41, %v1336_v52  ;;  %v349_v51 = vmul.f32 %v344_v40, %v1340_v53 }
 0x28e   :  { %v458_v43 = vadd.f32 %v454_v39, %v1429_v21  ;;  %v357_v44 = vpop.permute.xlu0 %356  ;;  %v353_v45 = vpop.permute.xlu1 %352  ;;  %v459_v58 = vadd.f32 %v455_v42, %v1427_v20 }
 0x28f   :  { %v360_v48 = vsel %vm271_vm3, %v353_v45, %v357_v44  ;;  %v362_v49 = vsel %vm271_vm3, %v357_v44, %v353_v45 }
 0x290   :  { %v364_v56 = vmul.f32 %v360_v48, %v1345_v54  ;;  %v365_v57 = vmul.f32 %v362_v49, %v1349_v55  ;;  %v470_v60 = vadd.f32 1e-10, %v458_v43  ;;  %v471_v17 = vadd.f32 1e-10, %v459_v58 }
 0x292   :  { %v368_v21 = vadd.f32 %v364_v56, %v348_v50  ;;  %v369_v0 = vadd.f32 %v365_v57, %v349_v51  ;;  %v421_v1 = vpop.permute.xlu0 %420  ;;  %v417_v11 = vpop.permute.xlu1 %416  ;;  %v474_v18 = vmul.f32 %v470_v60, %v470_v60  ;;  %v475_v28 = vmul.f32 %v471_v17, %v471_v17 }
 0x293   :  { %v426_v20 = vsel %vm180_vm0, %v421_v1, %v417_v11  ;;  %v424_v32 = vsel %vm180_vm0, %v417_v11, %v421_v1 }
 0x294   :  { %v1099_v13 = vpop.eup %1098  ;;  %v372_v16 = vmul.f32 0.5, %v368_v21  ;;  %v373_v7 = vmul.f32 0.5, %v369_v0  ;;  %v478_v29 = vadd.f32 %v474_v18, %v466_v23  ;;  %v428_v59 = vmul.f32 %v426_v20, %v1286_v2 }
 0x295   :  { %v1101_v14 = vpop.eup %1100  ;;  %v1527_v15 = vmul.f32 %v1099_v13, %v470_v60  ;;  %v479_v39 = vadd.f32 %v475_v28, %v467_v36 }
 0x296   :  { %v437_v19 = vpop.permute.xlu0 %436  ;;  %v433_v22 = vpop.permute.xlu1 %432  ;;  %v1529_v24 = vmul.f32 %v1101_v14, %v471_v17  ;;  %v376_v25 = vadd.f32 %v372_v16, %v1451_v34  ;;  %v377_v26 = vadd.f32 %v373_v7, %v1453_v35  ;;  %v429_v35 = vmul.f32 %v424_v32, %v1290_v3 }
 0x297   :  { %v440_v27 = vsel %vm205_vm1, %v433_v22, %v437_v19  ;;  %v442_v30 = vsel %vm205_vm1, %v437_v19, %v433_v22  ;;  %1102 = vrsqrt.f32 %v478_v29  ;;  %vm496_vm4 = vcmp.eq.f32.partialorder %v478_v29, inf }
 0x298   :  { %v460_v12 = vadd.f32 1e-10, %v376_v25  ;;  %v444_v33 = vmul.f32 %v440_v27, %v1295_v4  ;;  %v461_v34 = vadd.f32 1e-10, %v377_v26  ;;  %v445_v37 = vmul.f32 %v442_v30, %v1299_v8 }
 0x299   :  { %v499_v14 = vand.u32 2147483648, %v478_v29  ;;  %vm503_vm5 = vcmp.eq.f32.partialorder %v479_v39, inf  ;;  %vm498_vm6 = vcmp.eq.f32.partialorder %v478_v29, 0.0  ;;  %v506_v17 = vand.u32 2147483648, %v479_v39 }
 0x29a   :  { %v448_v38 = vadd.f32 %v444_v33, %v428_v59  ;;  %1104 = vrcp.f32 %v460_v12  ;;  %v449_v40 = vadd.f32 %v445_v37, %v429_v35  ;;  %v464_v31 = vmul.f32 %v460_v12, %v460_v12 }
 0x29b   :  { %1106 = vrcp.f32 %v461_v34  ;;  %v465_v50 = vmul.f32 %v461_v34, %v461_v34  ;;  %vm505_vm7 = vcmp.eq.f32.partialorder %v479_v39, 0.0  ;;  %v1054_v36 = vmul.f32 -1.2276, %v1527_v15 }
 0x29c   :  { %v452_v41 = vmul.f32 0.5, %v448_v38  ;;  %v453_v42 = vmul.f32 0.5, %v449_v40  ;;  %1108 = vrsqrt.f32 %v479_v39  ;;  %v1055_v34 = vmul.f32 -1.2276, %v1529_v24 }
 0x29d   :  { %v695_v38 = vmul.f32 1.442695, %v1054_v36 }
 0x29e   :  { %v456_v43 = vadd.f32 %v452_v41, %v1475_v46  ;;  %v457_v44 = vadd.f32 %v453_v42, %v1477_v47 }
 0x2a0   :  { %v468_v45 = vadd.f32 1e-10, %v456_v43  ;;  %v469_v48 = vadd.f32 1e-10, %v457_v44 }
 0x2a1   :  { %v1103_v57 = vpop.eup %1102 }
 0x2a2   :  { %v472_v49 = vmul.f32 %v468_v45, %v468_v45  ;;  %v473_v51 = vmul.f32 %v469_v48, %v469_v48  ;;  %v495_v11 = vmul.f32 %v1103_v57, %v478_v29 }
 0x2a4   :  { %v476_v56 = vadd.f32 %v472_v49, %v464_v31  ;;  %v1105_v58 = vpop.eup %1104  ;;  %v477_v60 = vadd.f32 %v473_v51, %v465_v50  ;;  %v497_v13 = vsel %vm496_vm4, %v478_v29, %v495_v11  ;;  %v713_v51 = vmul.f32 0.2714, %v1527_v15 }
 0x2a5   :  { %v1107_v21 = vpop.eup %1106  ;;  %v1547_v0 = vmul.f32 %v1105_v58, %v468_v45  ;;  %v1551_v18 = vsel %vm498_vm6, %v499_v14, %v497_v13 }
 0x2a6   :  { %1110 = vrsqrt.f32 %v476_v56  ;;  %v1549_v1 = vmul.f32 %v1107_v21, %v469_v48  ;;  %v1109_v46 = vpop.eup %1108  ;;  %vm482_vm9 = vcmp.eq.f32.partialorder %v476_v56, inf  ;;  %v485_v20 = vand.u32 2147483648, %v476_v56 }
 0x2a7   :  { %1112 = vrsqrt.f32 %v477_v60  ;;  %v502_v47 = vmul.f32 %v1109_v46, %v479_v39  ;;  %vm484_vm10 = vcmp.eq.f32.partialorder %v476_v56, 0.0  ;;  %v512_v27 = vrot.slane %v1551_v18, 7 }
 0x2a8   :  { %vm489_vm11 = vcmp.eq.f32.partialorder %v477_v60, inf  ;;  %v492_v28 = vand.u32 2147483648, %v477_v60  ;;  %vm491_vm12 = vcmp.eq.f32.partialorder %v477_v60, 0.0  ;;  %v1052_v35 = vmul.f32 -1.2276, %v1547_v0 }
 0x2a9   :  { %v504_v16 = vsel %vm503_vm5, %v479_v39, %v502_v47  ;;  %v1053_v37 = vmul.f32 -1.2276, %v1549_v1  ;;  %v697_v39 = vmul.f32 1.442695, %v1055_v34  ;;  %1114 = vpow2.f32 %v695_v38 }
 0x2aa   :  { %v1553_v23 = vsel %vm505_vm7, %v506_v17, %v504_v16  ;;  %v691_v40 = vmul.f32 1.442695, %v1052_v35  ;;  %v711_v57 = vmul.f32 0.2714, %v1547_v0  ;;  %v712_v58 = vmul.f32 0.2714, %v1549_v1 }
 0x2ab   :  { %v515_v30 = vrot.slane %v1553_v23, 7  ;;  %v693_v41 = vmul.f32 1.442695, %v1053_v37  ;;  %1116 = vpow2.f32 %v697_v39  ;;  %v686_v21 = vmul.f32 1.2276, %v1529_v24 }
 0x2ac   :  { %1118 = vpow2.f32 %v691_v40  ;;  %v683_v11 = vmul.f32 1.2276, %v1547_v0  ;;  %v684_v47 = vmul.f32 1.2276, %v1549_v1 }
 0x2ad   :  { %1120 = vpow2.f32 %v693_v41  ;;  %v726_v17 = vmul.f32 1.8022, %v686_v21 }
 0x2b0   :  { %v1111_v7 = vpop.eup %1110 }
 0x2b1   :  { %v481_v19 = vmul.f32 %v1111_v7, %v476_v56  ;;  %v1113_v22 = vpop.eup %1112 }
 0x2b2   :  { %v488_v25 = vmul.f32 %v1113_v22, %v477_v60  ;;  %v724_v22 = vmul.f32 1.8022, %v684_v47 }
 0x2b3   :  { %v483_v26 = vsel %vm482_vm9, %v476_v56, %v481_v19  ;;  %v1115_v42 = vpop.eup %1114  ;;  %v714_v56 = vmul.f32 0.2714, %v1529_v24  ;;  %v723_v19 = vmul.f32 1.8022, %v683_v11 }
 0x2b4   :  { %v1556_v29 = vsel %vm484_vm10, %v485_v20, %v483_v26  ;;  %v490_v32 = vsel %vm489_vm11, %v477_v60, %v488_v25  ;;  %v701_v31 = vadd.f32 1.0, %v1115_v42  ;;  %v685_v60 = vmul.f32 1.2276, %v1527_v15 }
 0x2b5   :  { %v514_v12 = vsel %vm513_vm8, %v512_v27, %v1556_v29  ;;  %v1561_v59 = vsel %vm491_vm12, %v492_v28, %v490_v32  ;;  %v1117_v43 = vpop.eup %1116 }
 0x2b6   :  { %519 = vrot.lane.b32.xlu1 %v514_v12, %s1174_s21  ;;  %v516_v33 = vsel %vm513_vm8, %v515_v30, %v1561_v59  ;;  %v1119_v44 = vpop.eup %1118  ;;  %v702_v48 = vadd.f32 1.0, %v1117_v43  ;;  %1122 = vrcp.f32 %v701_v31  ;;  %v725_v7 = vmul.f32 1.8022, %v685_v60 }
 0x2b7   :  { %521 = vrot.lane.b32.xlu0 %v516_v33, %s1174_s21  ;;  %v1121_v45 = vpop.eup %1120  ;;  %v699_v49 = vadd.f32 1.0, %v1119_v44 }
 0x2b8   :  { %v700_v50 = vadd.f32 1.0, %v1121_v45  ;;  %1124 = vrcp.f32 %v702_v48 }
 0x2b9   :  { %1126 = vrcp.f32 %v699_v49 }
 0x2ba   :  { %527 = vrot.lane.b32.xlu1 %v514_v12, %s1173_s2  ;;  %1128 = vrcp.f32 %v700_v50 }
 0x2bb   :  { %529 = vrot.lane.b32.xlu0 %v516_v33, %s1173_s2  ;;  %1130 = vtanh.f32 %v713_v51 }
 0x2bc   :  { %1132 = vtanh.f32 %v714_v56 }
 0x2bd   :  { %1134 = vtanh.f32 %v711_v57 }
 0x2be   :  { %549 = vrot.lane.b32.xlu1 %v514_v12, %s1177_s27  ;;  %1136 = vtanh.f32 %v712_v58 }
 0x2bf   :  { %551 = vrot.lane.b32.xlu0 %v516_v33, %s1177_s27 }
 0x2c0   :  { %v1123_v46 = vpop.eup %1122 }
 0x2c1   :  { %v729_v20 = vmul.f32 %v1123_v46, %v725_v7  ;;  %v733_v26 = vsub.f32 1.0, %v1123_v46 }
 0x2c2   :  { %566 = vrot.lane.b32.xlu1 %v514_v12, %s1178_s28  ;;  %v1125_v13 = vpop.eup %1124 }
 0x2c3   :  { %568 = vrot.lane.b32.xlu0 %v516_v33, %s1178_s28  ;;  %v1127_v14 = vpop.eup %1126  ;;  %v730_v25 = vmul.f32 %v1125_v13, %v726_v17  ;;  %v734_v27 = vsub.f32 1.0, %v1125_v13  ;;  %v737_v1 = vmul.f32 %v733_v26, %v729_v20 }
 0x2c4   :  { %v1129_v16 = vpop.eup %1128  ;;  %v727_v28 = vmul.f32 %v1127_v14, %v723_v19  ;;  %v731_v32 = vsub.f32 1.0, %v1127_v14 }
 0x2c5   :  { %v1131_v15 = vpop.eup %1130  ;;  %v728_v24 = vmul.f32 %v1129_v16, %v724_v22  ;;  %v732_v30 = vsub.f32 1.0, %v1129_v16  ;;  %v738_v36 = vmul.f32 %v734_v27, %v730_v25 }
 0x2c6   :  { %597 = vrot.lane.b32.xlu1 %v514_v12, %s1176_s26  ;;  %v735_v34 = vmul.f32 %v731_v32, %v727_v28  ;;  %v721_v37 = vmul.f32 1.5707964, %v1131_v15 }
 0x2c7   :  { %599 = vrot.lane.b32.xlu0 %v516_v33, %s1176_s26  ;;  %v736_v35 = vmul.f32 %v732_v30, %v728_v24 }
 0x2c8   :  { %v741_v41 = vadd.f32 %v737_v1, %v721_v37 }
 0x2ca   :  { %605 = vrot.lane.b32.xlu1 %v514_v12, %s1175_s1  ;;  %v745_v45 = vmul.f32 57.29578, %v741_v41 }
 0x2cb   :  { %607 = vrot.lane.b32.xlu0 %v516_v33, %s1175_s1 }
 0x2cc   :  { %v750_v50 = vmul.f32 0.022222223, %v745_v45 }
 0x2ce   :  { %627 = vrot.lane.b32.xlu1 %v514_v12, %s1179_s29  ;;  %v1074_v58 = vround.rtne.f32 %v750_v50  ;;  %v636_v50 = vsub.s32 3, %v1212_v5 }
 0x2cf   :  { %629 = vrot.lane.b32.xlu0 %v516_v33, %s1179_s29 }
 0x2d0   :  { %v758_v11 = vmul.f32 0.25, %v1074_v58 }
 0x2d2   :  { %644 = vrot.lane.b32.xlu1 %v514_v12, %s1180_s30  ;;  %v1133_v12 = vpop.eup %1132  ;;  %v762_v17 = vfloor.f32 %v758_v11 }
 0x2d3   :  { %646 = vrot.lane.b32.xlu0 %v516_v33, %s1180_s30  ;;  %v1135_v0 = vpop.eup %1134  ;;  %v722_v38 = vmul.f32 1.5707964, %v1133_v12 }
 0x2d4   :  { %v1137_v33 = vpop.eup %1136  ;;  %v719_v39 = vmul.f32 1.5707964, %v1135_v0  ;;  %v766_v28 = vmul.f32 4.0, %v762_v17 }
 0x2d5   :  { %v720_v40 = vmul.f32 1.5707964, %v1137_v33  ;;  %v742_v42 = vadd.f32 %v738_v36, %v722_v38 }
 0x2d6   :  { %v739_v43 = vadd.f32 %v735_v34, %v719_v39 }
 0x2d7   :  { %v740_v44 = vadd.f32 %v736_v35, %v720_v40  ;;  %v746_v31 = vmul.f32 57.29578, %v742_v42  ;;  %v770_v35 = vsub.f32 %v1074_v58, %v766_v28 }
 0x2d8   :  { %v743_v48 = vmul.f32 57.29578, %v739_v43  ;;  %v559_v43 = vrot.slane %v1276_v62, %v1224_v9 }
 0x2d9   :  { %v744_v49 = vmul.f32 57.29578, %v740_v44  ;;  %v751_v51 = vmul.f32 0.022222223, %v746_v31  ;;  %v580_v44 = vrot.slane %v1281_v63, %v1227_v10 }
 0x2da   :  { %v748_v56 = vmul.f32 0.022222223, %v743_v48 }
 0x2db   :  { %v749_v57 = vmul.f32 0.022222223, %v744_v49  ;;  %v1075_v60 = vround.rtne.f32 %v751_v51 }
 0x2dc   :  { %v1072_v21 = vround.rtne.f32 %v748_v56 }
 0x2dd   :  { %v1073_v46 = vround.rtne.f32 %v749_v57  ;;  %v759_v47 = vmul.f32 0.25, %v1075_v60  ;;  %v1080_v57 = vtrunc.f32 %v770_v35 }
 0x2de   :  { %v756_v13 = vmul.f32 0.25, %v1072_v21 }
 0x2df   :  { %v757_v14 = vmul.f32 0.25, %v1073_v46  ;;  %v763_v19 = vfloor.f32 %v759_v47  ;;  %v1631_v28 = vcvt.f32.s32 %v1080_v57 }
 0x2e0   :  { %v760_v22 = vfloor.f32 %v756_v13 }
 0x2e1   :  { %v761_v20 = vfloor.f32 %v757_v14  ;;  %v767_v24 = vmul.f32 4.0, %v763_v19  ;;  %v1619_v19 = vrot.slane %v1276_v62, %v636_v50  ;;  %vm830_vm12 = vcmp.eq.s32.totalorder %v1631_v28, 2 }
 0x2e2   :  { %v764_v32 = vmul.f32 4.0, %v760_v22 }
 0x2e3   :  { %v765_v30 = vmul.f32 4.0, %v761_v20  ;;  %v771_v37 = vsub.f32 %v1075_v60, %v767_v24 }
 0x2e4   :  { %v768_v40 = vsub.f32 %v1072_v21, %v764_v32 }
 0x2e5   :  { %v769_v41 = vsub.f32 %v1073_v46, %v765_v30  ;;  %v1082_v58 = vtrunc.f32 %v771_v37 }
 0x2e6   :  { %v1076_v51 = vtrunc.f32 %v768_v40 }
 0x2e7   :  { %v1078_v56 = vtrunc.f32 %v769_v41  ;;  %v1633_v24 = vcvt.f32.s32 %v1082_v58 }
 0x2e9   :  { %vm779_vm5 = vcmp.eq.s32.totalorder %v1633_v24, 0  ;;  %vm803_vm9 = vcmp.eq.s32.totalorder %v1633_v24, 1 }
 0x328   :  { %v520_v16 = vpop.permute.xlu1 %519 }
 0x329   :  { %v522_v7 = vpop.permute.xlu0 %521 }
 0x32a   :  { %v523_v0 = vsel %vm205_vm1, %v520_v16, %v522_v7  ;;  %v524_v33 = vsel %vm205_vm1, %v522_v7, %v520_v16  ;;  %v653_v16 = vsub.s32 7, %v1212_v5 }
 0x32b   :  { %v525_v38 = vmul.f32 %v523_v0, %v1295_v4  ;;  %v526_v39 = vmul.f32 %v524_v33, %v1299_v8 }
 0x32c   :  { %v528_v25 = vpop.permute.xlu1 %527  ;;  %v654_v0 = vrot.slane %v1276_v62, %v653_v16  ;;  %v658_v33 = vrot.slane %v1281_v63, %v653_v16 }
 0x32d   :  { %v530_v26 = vpop.permute.xlu0 %529 }
 0x32e   :  { %v531_v27 = vsel %vm180_vm0, %v528_v25, %v530_v26  ;;  %v532_v15 = vsel %vm180_vm0, %v530_v26, %v528_v25  ;;  %v1624_v26 = vrot.slane %v1281_v63, %v636_v50  ;;  %vm648_vm0 = vcmp.lt.s32.totalorder %v1271_v61, 15 }
 0x32f   :  { %v533_v1 = vmul.f32 %v532_v15, %v1286_v2  ;;  %v534_v36 = vmul.f32 %v531_v27, %v1290_v3  ;;  %v563_v2 = vrot.slane %v1281_v63, %v1224_v9  ;;  %v576_v3 = vrot.slane %v1276_v62, %v1227_v10 }
 0x330   :  { %v550_v12 = vpop.permute.xlu1 %549  ;;  %v1627_v27 = vcvt.f32.s32 %v1076_v51  ;;  %v1629_v15 = vcvt.f32.s32 %v1078_v56 }
 0x331   :  { %v552_v34 = vpop.permute.xlu0 %551  ;;  %v535_v45 = vmax.f32 %v525_v38, %v533_v1  ;;  %v536_v31 = vmax.f32 %v526_v39, %v534_v36 }
 0x332   :  { %v554_v4 = vsel %vm553_vm13, %v550_v12, %v552_v34  ;;  %v555_v8 = vsel %vm553_vm13, %v552_v34, %v550_v12  ;;  %vm776_vm1 = vcmp.eq.s32.totalorder %v1627_v27, 0  ;;  %vm777_vm4 = vcmp.eq.s32.totalorder %v1629_v15, 0 }
 0x333   :  { %v564_v60 = vmul.f32 %v559_v43, %v554_v4  ;;  %v565_v21 = vmul.f32 %v563_v2, %v555_v8  ;;  %v539_v47 = vrot.slane %v535_v45, 1  ;;  %v540_v13 = vrot.slane %v536_v31, 1 }
 0x334   :  { %v567_v42 = vpop.permute.xlu1 %566  ;;  %v545_v22 = vsub.f32 %v1556_v29, %v535_v45  ;;  %v546_v20 = vsub.f32 %v1561_v59, %v536_v31  ;;  %vm800_vm6 = vcmp.eq.s32.totalorder %v1627_v27, 1  ;;  %vm801_vm7 = vcmp.eq.s32.totalorder %v1629_v15, 1 }
 0x335   :  { %v569_v48 = vpop.permute.xlu0 %568  ;;  %v1636_v32 = vsub.f32 %v1551_v18, %v539_v47  ;;  %v1639_v30 = vsub.f32 %v1553_v23, %v540_v13  ;;  %vm828_vm10 = vcmp.eq.s32.totalorder %v1627_v27, 2  ;;  %vm829_vm11 = vcmp.eq.s32.totalorder %v1629_v15, 2 }
 0x336   :  { %v571_v49 = vsel %vm570_vm14, %v567_v42, %v569_v48  ;;  %v572_v9 = vsel %vm570_vm14, %v569_v48, %v567_v42  ;;  %v783_v37 = vrot.slane %v545_v22, %v1215_v6  ;;  %v787_v38 = vrot.slane %v546_v20, %v1215_v6 }
 0x337   :  { %v581_v46 = vmul.f32 %v576_v3, %v572_v9  ;;  %v582_v11 = vmul.f32 %v580_v44, %v571_v49  ;;  %v791_v45 = vrot.slane %v1636_v32, %v1215_v6  ;;  %v795_v31 = vrot.slane %v1639_v30, %v1215_v6 }
 0x338   :  { %v598_v10 = vpop.permute.xlu1 %597  ;;  %vm831_vm13 = vcmp.eq.s32.totalorder %v1633_v24, 2  ;;  %vm856_vm14 = vcmp.eq.s32.totalorder %v1627_v27, 3 }
 0x339   :  { %v600_v14 = vpop.permute.xlu0 %599  ;;  %v583_v7 = vmax.f32 %v564_v60, %v581_v46  ;;  %v584_v17 = vmax.f32 %v565_v21, %v582_v11 }
 0x33a   :  { %v601_v34 = vsel %vm271_vm3, %v598_v10, %v600_v14  ;;  %v602_v35 = vsel %vm271_vm3, %v600_v14, %v598_v10  ;;  %vm778_vm3 = vcmp.eq.s32.totalorder %v1631_v28, 0 }
 0x33b   :  { %v587_v1 = vrot.slane %v583_v7, 1  ;;  %v588_v36 = vrot.slane %v584_v17, 1  ;;  %v593_v63 = vsub.f32 %v1556_v29, %v583_v7  ;;  %v594_v41 = vsub.f32 %v1561_v59, %v584_v17 }
 0x33c   :  { %v606_v25 = vpop.permute.xlu1 %605  ;;  %v603_v42 = vmul.f32 %v601_v34, %v1345_v54  ;;  %v604_v43 = vmul.f32 %v602_v35, %v1349_v55  ;;  %v798_v30 = vsel %vm778_vm3, %v791_v45, 0.0 }
 0x33d   :  { %v608_v12 = vpop.permute.xlu0 %607  ;;  %v595_v4 = vsub.f32 %v1551_v18, %v587_v1  ;;  %v596_v8 = vsub.f32 %v1553_v23, %v588_v36  ;;  %v807_v49 = vrot.slane %v593_v63, %v1215_v6  ;;  %v811_v9 = vrot.slane %v594_v41, %v1215_v6 }
 0x33e   :  { %v609_v39 = vsel %vm246_vm2, %v606_v25, %v608_v12  ;;  %v610_v62 = vsel %vm246_vm2, %v608_v12, %v606_v25  ;;  %vm802_vm2 = vcmp.eq.s32.totalorder %v1631_v28, 1  ;;  %v799_v12 = vsel %vm779_vm5, %v795_v31, 0.0 }
 0x33f   :  { %v611_v2 = vmul.f32 %v610_v62, %v1336_v52  ;;  %v612_v3 = vmul.f32 %v609_v39, %v1340_v53  ;;  %v796_v52 = vsel %vm776_vm1, %v783_v37, 0.0  ;;  %v797_v53 = vsel %vm777_vm4, %v787_v38, 0.0 }
 0x340   :  { %v628_v40 = vpop.permute.xlu1 %627  ;;  %v815_v21 = vrot.slane %v595_v4, %v1215_v6  ;;  %v819_v46 = vrot.slane %v596_v8, %v1215_v6  ;;  %vm859_vm1 = vcmp.eq.s32.totalorder %v1633_v24, 3 }
 0x341   :  { %v630_v44 = vpop.permute.xlu0 %629  ;;  %v613_v54 = vmax.f32 %v603_v42, %v611_v2  ;;  %v614_v55 = vmax.f32 %v604_v43, %v612_v3 }
 0x342   :  { %v632_v50 = vsel %vm631_vm15, %v628_v40, %v630_v44  ;;  %v633_v51 = vsel %vm631_vm15, %v630_v44, %v628_v40  ;;  %vm857_vm15 = vcmp.eq.s32.totalorder %v1629_v15, 3  ;;  %v822_v1 = vsel %vm802_vm2, %v815_v21, 0.0 }
 0x343   :  { %v617_v56 = vrot.slane %v613_v54, 1  ;;  %v618_v10 = vrot.slane %v614_v55, 1  ;;  %v623_v57 = vsub.f32 %v1556_v29, %v613_v54  ;;  %v624_v58 = vsub.f32 %v1561_v59, %v614_v55 }
 0x344   :  { %v645_v48 = vpop.permute.xlu1 %644  ;;  %v642_v17 = vmul.f32 %v1619_v19, %v632_v50  ;;  %v643_v22 = vmul.f32 %v1624_v26, %v633_v51  ;;  %v820_v19 = vsel %vm800_vm6, %v807_v49, 0.0  ;;  %v821_v26 = vsel %vm801_vm7, %v811_v9, 0.0 }
 0x345   :  { %v647_v60 = vpop.permute.xlu0 %646  ;;  %v625_v13 = vsub.f32 %v1551_v18, %v617_v56  ;;  %v626_v14 = vsub.f32 %v1553_v23, %v618_v10  ;;  %v835_v16 = vrot.slane %v623_v57, %v1215_v6  ;;  %v839_v7 = vrot.slane %v624_v58, %v1215_v6 }
 0x346   :  { %v649_v11 = vsel %vm648_vm0, %v645_v48, %v647_v60  ;;  %v650_v47 = vsel %vm648_vm0, %v647_v60, %v645_v48  ;;  %vm858_vm0 = vcmp.eq.s32.totalorder %v1631_v28, 3  ;;  %v823_v36 = vsel %vm803_vm9, %v819_v46, 0.0 }
 0x347   :  { %v659_v20 = vmul.f32 %v654_v0, %v650_v47  ;;  %v660_v25 = vmul.f32 %v658_v33, %v649_v11  ;;  %v843_v61 = vrot.slane %v625_v13, %v1215_v6  ;;  %v847_v32 = vrot.slane %v626_v14, %v1215_v6 }
 0x348   :  { %v848_v34 = vsel %vm828_vm10, %v835_v16, 0.0  ;;  %v849_v35 = vsel %vm829_vm11, %v839_v7, 0.0  ;;  %v824_v40 = vadd.f32 %v820_v19, %v796_v52  ;;  %v825_v63 = vadd.f32 %v821_v26, %v797_v53 }
 0x349   :  { %v661_v0 = vmax.f32 %v642_v17, %v659_v20  ;;  %v662_v33 = vmax.f32 %v643_v22, %v660_v25  ;;  %v850_v41 = vsel %vm830_vm12, %v843_v61, 0.0  ;;  %v851_v42 = vsel %vm831_vm13, %v847_v32, 0.0 }
 0x34a   :  { %v826_v45 = vadd.f32 %v822_v1, %v798_v30  ;;  %v827_v31 = vadd.f32 %v823_v36, %v799_v12  ;;  %v852_v4 = vadd.f32 %v848_v34, %v824_v40  ;;  %v853_v8 = vadd.f32 %v849_v35, %v825_v63 }
 0x34b   :  { %v665_v37 = vrot.slane %v661_v0, 1  ;;  %v666_v38 = vrot.slane %v662_v33, 1  ;;  %v671_v39 = vsub.f32 %v1556_v29, %v661_v0  ;;  %v672_v62 = vsub.f32 %v1561_v59, %v662_v33 }
 0x34c   :  { %v854_v48 = vadd.f32 %v850_v41, %v826_v45  ;;  %v855_v49 = vadd.f32 %v851_v42, %v827_v31  ;;  %vm1040_vm7 = vcmask 1043459   ;;  %vm1042_vm2 = vcmask 1045509  }
 0x34d   :  { %v673_v43 = vsub.f32 %v1551_v18, %v665_v37  ;;  %v674_v2 = vsub.f32 %v1553_v23, %v666_v38  ;;  %v863_v3 = vrot.slane %v671_v39, %v1215_v6  ;;  %v867_v44 = vrot.slane %v672_v62, %v1215_v6 }
 0x34e   :  { %vm1044_vm9 = vcmask 1047559  }
 0x34f   :  { %v871_v52 = vrot.slane %v673_v43, %v1215_v6  ;;  %v875_v53 = vrot.slane %v674_v2, %v1215_v6  ;;  %v876_v54 = vsel %vm856_vm14, %v863_v3, 0.0  ;;  %v877_v55 = vsel %vm857_vm15, %v867_v44, 0.0 }
 0x350   :  { %v880_v9 = vadd.f32 %v876_v54, %v852_v4  ;;  %v881_v50 = vadd.f32 %v877_v55, %v853_v8 }
 0x351   :  { %v878_v51 = vsel %vm858_vm0, %v871_v52, 0.0  ;;  %v879_v56 = vsel %vm859_vm1, %v875_v53, 0.0 }
 0x352   :  { %v882_v10 = vadd.f32 %v878_v51, %v854_v48  ;;  %v883_v57 = vadd.f32 %v879_v56, %v855_v49  ;;  %vm884_vm4 = vcmp.gt.f32.partialorder %v880_v9, 0.0  ;;  %vm885_vm3 = vcmp.gt.f32.partialorder %v881_v50, 0.0 }
 0x353   :  { %v888_v6 = vsel %vm884_vm4, %v1556_v29, 0.0  ;;  %v889_v27 = vsel %vm885_vm3, %v1561_v59, 0.0 }
 0x354   :  { %vm886_vm5 = vcmp.gt.f32.partialorder %v882_v10, 0.0  ;;  %vm887_vm6 = vcmp.gt.f32.partialorder %v883_v57, 0.0  ;;  %v892_v60 = vmax.f32 %v888_v6, %v889_v27 }
 0x355   :  { %v890_v15 = vsel %vm886_vm5, %v1551_v18, 0.0  ;;  %v891_v58 = vsel %vm887_vm6, %v1553_v23, 0.0 }
 0x356   :  { %v893_v28 = vmax.f32 %v890_v15, %v891_v58 }
 0x358   :  { %v894_v21 = vmax.f32 %v892_v60, %v893_v28 }
 0x35a   :  { %895 = vmax.xlane.f32.xlu1 %v894_v21 }
 0x3e7   :  { %v896_v24 = vpop.xlane.xlu1 %895 }
 0x3e8   :  { %v897_v46 = vrot.slane %v896_v24, 4 }
 0x3ea   :  { %v898_v11 = vmax.f32 %v896_v24, %v897_v46 }
 0x3ec   :  { %v899_v47 = vrot.slane %v898_v11, 2 }
 0x3ee   :  { %v900_v13 = vmax.f32 %v898_v11, %v899_v47 }
 0x3f0   :  { %v901_v14 = vrot.slane %v900_v13, 1 }
 0x3f2   :  { %v902_v16 = vmax.f32 %v900_v13, %v901_v14 }
 0x3f4   :  { %1084 = vpush %v902_v16 }
 0x425   :  { %s1085_s4 = spop %1084 }
 0x426   :  { %v904_v29 = vstv %s1085_s4 }
 0x427   :  { %1138 = vrcp.f32 %v904_v29 }
 0x431   :  { %v1139_v59 = vpop.eup %1138 }
 0x432   :  { %v906_v7 = vmul.f32 %v1139_v59, %v888_v6  ;;  %v907_v18 = vmul.f32 %v1139_v59, %v889_v27  ;;  %v908_v17 = vmul.f32 %v1139_v59, %v890_v15  ;;  %v909_v23 = vmul.f32 %v1139_v59, %v891_v58 }
 0x434   :  { %v1056_v22 = vadd.f32 -0.2, %v906_v7  ;;  %v1057_v20 = vadd.f32 -0.2, %v907_v18  ;;  %v1058_v25 = vadd.f32 -0.2, %v908_v17 }
 0x435   :  { %v1059_v61 = vadd.f32 -0.2, %v909_v23  ;;  %v1064_v32 = vadd.f32 -0.1, %v906_v7  ;;  %v1065_v30 = vadd.f32 -0.1, %v907_v18 }
 0x436   :  { %v1060_v12 = vmul.f32 -1000.0, %v1056_v22  ;;  %v1061_v19 = vmul.f32 -1000.0, %v1057_v20  ;;  %v1062_v26 = vmul.f32 -1000.0, %v1058_v25  ;;  %v1066_v0 = vadd.f32 -0.1, %v908_v17 }
 0x437   :  { %v1063_v33 = vmul.f32 -1000.0, %v1059_v61  ;;  %v1067_v1 = vadd.f32 -0.1, %v909_v23  ;;  %v1068_v36 = vmul.f32 -1000.0, %v1064_v32  ;;  %v1069_v34 = vmul.f32 -1000.0, %v1065_v30 }
 0x438   :  { %v922_v35 = vmul.f32 1.442695, %v1060_v12  ;;  %v924_v37 = vmul.f32 1.442695, %v1061_v19  ;;  %v926_v38 = vmul.f32 1.442695, %v1062_v26 }
 0x439   :  { %v928_v39 = vmul.f32 1.442695, %v1063_v33  ;;  %v1070_v62 = vmul.f32 -1000.0, %v1066_v0  ;;  %v1071_v40 = vmul.f32 -1000.0, %v1067_v1  ;;  %v954_v63 = vmul.f32 1.442695, %v1068_v36 }
 0x43a   :  { %1140 = vpow2.f32 %v922_v35  ;;  %v956_v41 = vmul.f32 1.442695, %v1069_v34  ;;  %v1181_v1 = vmov 1983009808  }
 0x43b   :  { %1142 = vpow2.f32 %v924_v37  ;;  %v958_v42 = vmul.f32 1.442695, %v1070_v62  ;;  %v960_v43 = vmul.f32 1.442695, %v1071_v40  ;;  %v1020_v36 = vunpack.c.l.s4 %v1181_v1 }
 0x43c   :  { %1144 = vpow2.f32 %v926_v38 }
 0x43d   :  { %1146 = vpow2.f32 %v928_v39 }
 0x43e   :  { %1148 = vpow2.f32 %v954_v63 }
 0x43f   :  { %1150 = vpow2.f32 %v956_v41  ;;  %v1021_v41 = vunpack.c.0.s8 %v1020_v36 }
 0x440   :  { %1152 = vpow2.f32 %v958_v42 }
 0x441   :  { %1154 = vpow2.f32 %v960_v43 }
 0x444   :  { %v1141_v2 = vpop.eup %1140 }
 0x445   :  { %v1143_v3 = vpop.eup %1142  ;;  %v930_v44 = vadd.f32 1.0, %v1141_v2 }
 0x446   :  { %v1145_v45 = vpop.eup %1144  ;;  %v931_v31 = vadd.f32 1.0, %v1143_v3 }
 0x447   :  { %v1147_v4 = vpop.eup %1146  ;;  %v932_v8 = vadd.f32 1.0, %v1145_v45  ;;  %1156 = vrcp.f32 %v930_v44 }
 0x448   :  { %v1149_v52 = vpop.eup %1148  ;;  %v933_v53 = vadd.f32 1.0, %v1147_v4  ;;  %1158 = vrcp.f32 %v931_v31  ;;  %v1024_v31 = vsub.s32 %v1021_v41, %v1212_v5 }
 0x449   :  { %v1151_v54 = vpop.eup %1150  ;;  %1160 = vrcp.f32 %v932_v8  ;;  %v962_v55 = vadd.f32 1.0, %v1149_v52 }
 0x44a   :  { %v1153_v48 = vpop.eup %1152  ;;  %1162 = vrcp.f32 %v933_v53  ;;  %v963_v49 = vadd.f32 1.0, %v1151_v54 }
 0x44b   :  { %v1155_v9 = vpop.eup %1154  ;;  %v964_v50 = vadd.f32 1.0, %v1153_v48  ;;  %1164 = vrcp.f32 %v962_v55 }
 0x44c   :  { %v965_v51 = vadd.f32 1.0, %v1155_v9  ;;  %1166 = vrcp.f32 %v963_v49 }
 0x44d   :  { %1168 = vrcp.f32 %v964_v50 }
 0x44e   :  { %1170 = vrcp.f32 %v965_v51 }
 0x451   :  { %v1157_v56 = vpop.eup %1156 }
 0x452   :  { %v1159_v10 = vpop.eup %1158 }
 0x453   :  { %v1161_v57 = vpop.eup %1160 }
 0x454   :  { %v1163_v6 = vpop.eup %1162 }
 0x455   :  { %v1165_v27 = vpop.eup %1164 }
 0x456   :  { %v1167_v15 = vpop.eup %1166  ;;  %v974_v58 = vadd.f32 %v1165_v27, %v1157_v56 }
 0x457   :  { %v1169_v60 = vpop.eup %1168  ;;  %v975_v28 = vadd.f32 %v1167_v15, %v1159_v10 }
 0x458   :  { %v1171_v21 = vpop.eup %1170  ;;  %v976_v24 = vadd.f32 %v1169_v60, %v1161_v57  ;;  %v978_v46 = vmul.f32 0.5, %v974_v58 }
 0x459   :  { %v977_v11 = vadd.f32 %v1171_v21, %v1163_v6  ;;  %v979_v47 = vmul.f32 0.5, %v975_v28 }
 0x45a   :  { %v980_v13 = vmul.f32 0.5, %v976_v24  ;;  %v982_v14 = vrot.slane %v978_v46, 4 }
 0x45b   :  { %v981_v16 = vmul.f32 0.5, %v977_v11  ;;  %v988_v29 = vrot.slane %v979_v47, 4 }
 0x45c   :  { %v983_v59 = vadd.f32 %v982_v14, %v978_v46  ;;  %v994_v7 = vrot.slane %v980_v13, 4 }
 0x45d   :  { %v989_v18 = vadd.f32 %v988_v29, %v979_v47  ;;  %v1000_v17 = vrot.slane %v981_v16, 4 }
 0x45e   :  { %v984_v23 = vrot.slane %v983_v59, 2  ;;  %v995_v22 = vadd.f32 %v994_v7, %v980_v13 }
 0x45f   :  { %v990_v20 = vrot.slane %v989_v18, 2  ;;  %v1001_v25 = vadd.f32 %v1000_v17, %v981_v16 }
 0x460   :  { %v985_v61 = vadd.f32 %v984_v23, %v983_v59  ;;  %v996_v32 = vrot.slane %v995_v22, 2 }
 0x461   :  { %v991_v30 = vadd.f32 %v990_v20, %v989_v18  ;;  %v1002_v12 = vrot.slane %v1001_v25, 2 }
 0x462   :  { %v986_v19 = vrot.slane %v985_v61, 1  ;;  %v997_v26 = vadd.f32 %v996_v32, %v995_v22 }
 0x463   :  { %v992_v0 = vrot.slane %v991_v30, 1  ;;  %v1003_v33 = vadd.f32 %v1002_v12, %v1001_v25 }
 0x464   :  { %v987_v34 = vadd.f32 %v986_v19, %v985_v61  ;;  %v998_v35 = vrot.slane %v997_v26, 1 }
 0x465   :  { %v993_v37 = vadd.f32 %v992_v0, %v991_v30  ;;  %v1004_v38 = vrot.slane %v1003_v33, 1 }
 0x466   :  { %v999_v39 = vadd.f32 %v998_v35, %v997_v26  ;;  %v1006_v62 = vmax.f32 %v987_v34, 0.0 }
 0x467   :  { %v1005_v40 = vadd.f32 %v1004_v38, %v1003_v33  ;;  %v1007_v63 = vmax.f32 %v993_v37, 0.0 }
 0x468   :  { %v1008_v42 = vmax.f32 %v999_v39, 0.0  ;;  %v1010_v2 = vmin.f32 %v1006_v62, 1.0 }
 0x469   :  { %v1009_v43 = vmax.f32 %v1005_v40, 0.0  ;;  %v1011_v3 = vmin.f32 %v1007_v63, 1.0 }
 0x46a   :  { %v1012_v44 = vmin.f32 %v1008_v42, 1.0 }
 0x46b   :  { %v1013_v45 = vmin.f32 %v1009_v43, 1.0  ;;  %v1018_v4 = vcombine.low %v1010_v2, %v1011_v3 }
 0x46d   :  { %v1026_v8 = vcombine.low %v1012_v44, %v1013_v45  ;;  %v1025_v53 = vrot.slane %v1018_v4, %v1024_v31 }
 0x46f   :  { %v1033_v52 = vrot.slane %v1026_v8, %v1024_v31 }
 0x471   :  { %v1038_v54 = vrot.slane %v1033_v52, 7 }
 0x473   :  { %v1039_v55 = vsel %vm513_vm8, %v1038_v54, %v1025_v53 }
 0x474   :  { %v1041_v48 = vsel %vm1040_vm7, %v1038_v54, %v1039_v55 }
 0x475   :  { %v1043_v49 = vsel %vm1042_vm2, %v1038_v54, %v1041_v48 }
 0x476   :  { %v1045_v9 = vsel %vm1044_vm9, %v1038_v54, %v1043_v49 }
 0x477   :  { %1047 = vst [vmem:[%s1755_s3] sm:$0xf] %v1045_v9 }

</bundles_post_ra>
